<compile_context>
chip_gen: v7x
topology: tpu7x:2x2x1
jax: 0.10.0
libtpu: 0.0.40
codegen_flags: <defaults>
</compile_context>

<pallas_src>
import functools

import jax
import jax.numpy as jnp
from jax.experimental import pallas as pl
from jax.experimental.pallas import tpu as pltpu

LATENT_D = 128          # input_size_diff = output_size_diff = num_units = 128
N_STEPS = 100
TB_MAX = 2048           # max batch rows per grid step (fits VMEM on all gens)


def _round_up(a, m):
    return ((a + m - 1) // m) * m


def _cdiv(a, b):
    return -(-a // b)


def _device_kind():
    try:
        return jax.devices()[0].device_kind.lower()
    except Exception:  # pragma: no cover - defensive
        return ""


# --------------------------------------------------------------------------
# Kernels
# --------------------------------------------------------------------------
def _mlp_tail(h1, emb2, emb3, w2_ref, w3_ref, w4_ref, b4_ref, o_ref):
    """Layers 2..4 shared by all kernel variants. h1 is the post-ReLU layer-1
    output in f32; emb2/emb3 already contain b2/b3 folded in."""
    h = jnp.dot(h1.astype(jnp.bfloat16), w2_ref[...],
                preferred_element_type=jnp.float32)
    h = jnp.maximum(h + emb2, 0.0)
    h = jnp.dot(h.astype(jnp.bfloat16), w3_ref[...],
                preferred_element_type=jnp.float32)
    h = jnp.maximum(h + emb3, 0.0)
    h = jnp.dot(h.astype(jnp.bfloat16), w4_ref[...],
                preferred_element_type=jnp.float32)
    h = jnp.maximum(h + b4_ref[...], 0.0)
    o_ref[...] = h.astype(o_ref.dtype)


def mlp_diffusion_kernel_fused(t_ref, x_ref, table_ref,
                               w2_ref, w3_ref, w4_ref, b4_ref, o_ref):
    """v6e/v7x variant: embedding gather fused into the first (K=256) dot."""
    tb, d = x_ref.shape
    n_pad = table_ref.shape[0] - d

    xb = x_ref[...].astype(jnp.bfloat16)                            # in-kernel cast
    t_col = t_ref[...]                                              # [tb, 1] i32
    steps = jax.lax.broadcasted_iota(jnp.int32, (tb, n_pad), 1)     # [tb, n_pad]
    onehot = (steps == t_col).astype(jnp.bfloat16)

    lhs = jnp.concatenate([xb, onehot], axis=1)                     # [tb, d+n_pad]
    # cols 0:d   = x @ w1 + b1 + emb1[t]
    # cols d:2d  = b2 + emb2[t]
    # cols 2d:3d = b3 + emb3[t]
    fused = jnp.dot(lhs, table_ref[...], preferred_element_type=jnp.float32)

    h1 = jnp.maximum(fused[:, 0:d], 0.0)
    _mlp_tail(h1, fused[:, d:2 * d], fused[:, 2 * d:3 * d],
              w2_ref, w3_ref, w4_ref, b4_ref, o_ref)


def mlp_diffusion_kernel_split(t_ref, x_ref, table_ref,
                               w2_ref, w3_ref, w4_ref, b4_ref, o_ref):
    """v5e variant: 128-wide dots (natively matched to the 4x128^2 MXU)."""
    tb, d = x_ref.shape
    n_pad = table_ref.shape[0] - d

    xb = x_ref[...].astype(jnp.bfloat16)
    t_col = t_ref[...]
    steps = jax.lax.broadcasted_iota(jnp.int32, (tb, n_pad), 1)
    onehot = (steps == t_col).astype(jnp.bfloat16)

    emb = jnp.dot(onehot, table_ref[d:, :],
                  preferred_element_type=jnp.float32)               # [tb, 3d]
    w1 = table_ref[0:d, 0:d]                                        # resident slice
    h = jnp.dot(xb, w1, preferred_element_type=jnp.float32)
    h1 = jnp.maximum(h + emb[:, 0:d], 0.0)
    _mlp_tail(h1, emb[:, d:2 * d], emb[:, 2 * d:3 * d],
              w2_ref, w3_ref, w4_ref, b4_ref, o_ref)


def mlp_diffusion_uniform_t_kernel(t_sm_ref, x_ref, w1_ref, emb_ref,
                                   w2_ref, w3_ref, w4_ref, b4_ref, o_ref):
    """Fast path when every row shares one timestep: no one-hot gather matmul,
    just a single dynamic-row read of the fused (emb+bias) table."""
    tb, d = x_ref.shape
    t = t_sm_ref[0]
    emb = emb_ref[pl.ds(t, 1), :]                                   # [1, 3d] f32
    h = jnp.dot(x_ref[...].astype(jnp.bfloat16), w1_ref[...],
                preferred_element_type=jnp.float32)
    h1 = jnp.maximum(h + emb[:, 0:d], 0.0)
    _mlp_tail(h1, emb[:, d:2 * d], emb[:, 2 * d:3 * d],
              w2_ref, w3_ref, w4_ref, b4_ref, o_ref)


# --------------------------------------------------------------------------
# Parameter prep
# --------------------------------------------------------------------------
def prepare_params(params):
    """One-time prep: transpose weights, fold b1..b3 into the embedding tables,
    stack w1 on top to build the fused layer-1 table."""
    d = params["w1"].shape[0]
    emb_all = jnp.concatenate(
        [params["emb1"] + params["b1"][None, :],
         params["emb2"] + params["b2"][None, :],
         params["emb3"] + params["b3"][None, :]], axis=1)           # [n_steps, 3d]
    n_steps = emb_all.shape[0]
    n_pad = _round_up(n_steps, 128)                                 # lane-align K
    emb_all = jnp.pad(emb_all, ((0, n_pad - n_steps), (0, 0)))      # f32

    w1_t = params["w1"].T                                           # [in, out]
    w1_row = jnp.concatenate(
        [w1_t, jnp.zeros((d, 2 * d), w1_t.dtype)], axis=1)          # [d, 3d]
    table = jnp.concatenate([w1_row, emb_all], axis=0)              # [d+n_pad, 3d]

    return {
        "table": table.astype(jnp.bfloat16),       # fused layer-1 table, resident
        "emb_rows": emb_all.astype(jnp.float32),   # f32 rows for uniform-t path
        "w1": w1_t.astype(jnp.bfloat16),
        "w2": params["w2"].T.astype(jnp.bfloat16),
        "w3": params["w3"].T.astype(jnp.bfloat16),
        "w4": params["w4"].T.astype(jnp.bfloat16),
        "b4": params["b4"].reshape(1, d).astype(jnp.float32),
    }


# --------------------------------------------------------------------------
# Tiling helper
# --------------------------------------------------------------------------
def _choose_tiling(B, tb_max, force_multi_step):
    Bp = _round_up(max(B, 8), 8)
    grid_b = _cdiv(Bp, tb_max)
    if force_multi_step and Bp >= 16:
        grid_b = max(grid_b, 2)        # keep both TensorCores busy (v7x megacore)
    tb = _round_up(_cdiv(Bp, grid_b), 8)
    Bp = tb * grid_b
    return Bp, tb, grid_b


# --------------------------------------------------------------------------
# Forward (general per-row t)
# --------------------------------------------------------------------------
@functools.partial(jax.jit, static_argnames=("tb_max", "out_dtype",
                                              "use_fused", "force_multi_step"))
def _mlp_diffusion_forward_impl(x, t, table, w2, w3, w4, b4, *, tb_max,
                                out_dtype, use_fused, force_multi_step):
    B, D = x.shape
    k_tot, three_d = table.shape
    Bp, tb, grid_b = _choose_tiling(B, tb_max, force_multi_step)

    t2 = t.astype(jnp.int32).reshape(B, 1)
    xi = x
    if Bp != B:
        xi = jnp.pad(xi, ((0, Bp - B), (0, 0)))
        t2 = jnp.pad(t2, ((0, Bp - B), (0, 0)))   # padded rows use t=0 (valid idx)

    kernel = mlp_diffusion_kernel_fused if use_fused else mlp_diffusion_kernel_split

    def batch_spec(bs):
        return pl.BlockSpec(bs, lambda i: (i, 0))

    def const_spec(bs):
        return pl.BlockSpec(bs, lambda i: (0, 0))

    out = pl.pallas_call(
        kernel,
        out_shape=jax.ShapeDtypeStruct((Bp, D), out_dtype),
        grid_spec=pltpu.PrefetchScalarGridSpec(
            num_scalar_prefetch=0,
            grid=(grid_b,),
            in_specs=[
                batch_spec((tb, 1)),            # t (per-row timestep indices)
                batch_spec((tb, D)),            # x (f32, cast in-kernel)
                const_spec((k_tot, three_d)),   # fused [w1 ; emb+bias] table
                const_spec((D, D)),             # w2
                const_spec((D, D)),             # w3
                const_spec((D, D)),             # w4
                const_spec((1, D)),             # b4
            ],
            out_specs=batch_spec((tb, D)),
        ),
        compiler_params=pltpu.CompilerParams(
            dimension_semantics=("parallel",),      # batch axis shards over TCs
            vmem_limit_bytes=64 * 1024 * 1024,
        ),
    )(t2, xi, table, w2, w3, w4, b4)

    return out[:B]


def mlp_diffusion_forward(x, t, prep, *, tb_max=TB_MAX, out_dtype=jnp.bfloat16,
                          use_fused=None, force_multi_step=None):
    """x: [B, 128] f32, t: [B] int32, prep: output of prepare_params."""
    kind = _device_kind()
    if use_fused is None:
        # v5e's 4x128^2 MXU is natively matched to 128-wide dots; keep split there.
        use_fused = "v5" not in kind
    if force_multi_step is None:
        # single-TC chips don't benefit from forcing >=2 grid steps.
        force_multi_step = not ("v5" in kind or "v6" in kind)
    return _mlp_diffusion_forward_impl(
        x, t, prep["table"], prep["w2"], prep["w3"], prep["w4"], prep["b4"],
        tb_max=tb_max, out_dtype=out_dtype, use_fused=use_fused,
        force_multi_step=force_multi_step)


# --------------------------------------------------------------------------
# Forward (batch-uniform t fast path, common in DDPM sampling)
# --------------------------------------------------------------------------
@functools.partial(jax.jit, static_argnames=("tb_max", "out_dtype",
                                              "force_multi_step"))
def _mlp_diffusion_forward_uniform_impl(x, t_scalar, w1, emb_rows, w2, w3, w4,
                                        b4, *, tb_max, out_dtype,
                                        force_multi_step):
    B, D = x.shape
    n_pad, three_d = emb_rows.shape
    Bp, tb, grid_b = _choose_tiling(B, tb_max, force_multi_step)

    xi = x if Bp == B else jnp.pad(x, ((0, Bp - B), (0, 0)))
    t_arr = jnp.asarray(t_scalar, dtype=jnp.int32).reshape(1)

    out = pl.pallas_call(
        mlp_diffusion_uniform_t_kernel,
        out_shape=jax.ShapeDtypeStruct((Bp, D), out_dtype),
        grid_spec=pltpu.PrefetchScalarGridSpec(
            num_scalar_prefetch=1,                     # t -> SMEM
            grid=(grid_b,),
            in_specs=[
                pl.BlockSpec((tb, D), lambda i, t_sm: (i, 0)),            # x
                pl.BlockSpec((D, D), lambda i, t_sm: (0, 0)),             # w1
                pl.BlockSpec((n_pad, three_d), lambda i, t_sm: (0, 0)),   # emb rows
                pl.BlockSpec((D, D), lambda i, t_sm: (0, 0)),             # w2
                pl.BlockSpec((D, D), lambda i, t_sm: (0, 0)),             # w3
                pl.BlockSpec((D, D), lambda i, t_sm: (0, 0)),             # w4
                pl.BlockSpec((1, D), lambda i, t_sm: (0, 0)),             # b4
            ],
            out_specs=pl.BlockSpec((tb, D), lambda i, t_sm: (i, 0)),
        ),
        compiler_params=pltpu.CompilerParams(
            dimension_semantics=("parallel",),
            vmem_limit_bytes=64 * 1024 * 1024,
        ),
    )(t_arr, xi, w1, emb_rows, w2, w3, w4, b4)
    return out[:B]


def mlp_diffusion_forward_uniform_t(x, t_scalar, prep, *, tb_max=TB_MAX,
                                    out_dtype=jnp.bfloat16,
                                    force_multi_step=None):
    kind = _device_kind()
    if force_multi_step is None:
        force_multi_step = not ("v5" in kind or "v6" in kind)
    return _mlp_diffusion_forward_uniform_impl(
        x, t_scalar, prep["w1"], prep["emb_rows"], prep["w2"], prep["w3"],
        prep["w4"], prep["b4"], tb_max=tb_max, out_dtype=out_dtype,
        force_multi_step=force_multi_step)


# --------------------------------------------------------------------------
# Reference & test harness
# --------------------------------------------------------------------------
def init_params(key, n_steps=N_STEPS, d=LATENT_D):
    ks = jax.random.split(key, 11)
    s = 1.0 / jnp.sqrt(d)
    return {
        "w1": jax.random.uniform(ks[0], (d, d), jnp.float32, -s, s),
        "b1": jax.random.uniform(ks[1], (d,), jnp.float32, -s, s),
        "w2": jax.random.uniform(ks[2], (d, d), jnp.float32, -s, s),
        "b2": jax.random.uniform(ks[3], (d,), jnp.float32, -s, s),
        "w3": jax.random.uniform(ks[4], (d, d), jnp.float32, -s, s),
        "b3": jax.random.uniform(ks[5], (d,), jnp.float32, -s, s),
        "w4": jax.random.uniform(ks[6], (d, d), jnp.float32, -s, s),
        "b4": jax.random.uniform(ks[7], (d,), jnp.float32, -s, s),
        "emb1": jax.random.normal(ks[8], (n_steps, d), jnp.float32),
        "emb2": jax.random.normal(ks[9], (n_steps, d), jnp.float32),
        "emb3": jax.random.normal(ks[10], (n_steps, d), jnp.float32),
    }


def reference_forward(x, t, params):
    def lin(h, w, b):
        return h @ w.T + b
    h = jnp.maximum(lin(x, params["w1"], params["b1"]) + params["emb1"][t], 0.0)
    h = jnp.maximum(lin(h, params["w2"], params["b2"]) + params["emb2"][t], 0.0)
    h = jnp.maximum(lin(h, params["w3"], params["b3"]) + params["emb3"][t], 0.0)
    h = jnp.maximum(lin(h, params["w4"], params["b4"]), 0.0)
    return h


def _check(out, ref, name):
    out32 = out.astype(jnp.float32)
    err = jnp.max(jnp.abs(out32 - ref))
    assert jnp.allclose(out32, ref, atol=1e-1, rtol=1e-1), (
        f"{name}: mismatch vs reference, max abs err = {err}")


if __name__ == "__main__":
    key = jax.random.PRNGKey(0)
    kp, kx, kt = jax.random.split(key, 3)

    B = 300   # deliberately not a multiple of 8 or of the batch tile
    params = init_params(kp)
    x = jax.random.normal(kx, (B, LATENT_D), jnp.float32)
    t = jax.random.randint(kt, (B,), 0, N_STEPS, jnp.int32)

    prep = prepare_params(params)
    ref = reference_forward(x, t, params)

    # Default path (device-kind-based kernel selection).
    out = jax.block_until_ready(mlp_diffusion_forward(x, t, prep))
    assert out.shape == (B, LATENT_D)
    _check(out, ref, "default")

    # Explicit v6e/v7x-style fused path with forced multi-step grid.
    out_f = jax.block_until_ready(
        mlp_diffusion_forward(x, t, prep, use_fused=True, force_multi_step=True))
    _check(out_f, ref, "fused")

    # Explicit v5e-style split path.
    out_s = jax.block_until_ready(
        mlp_diffusion_forward(x, t, prep, use_fused=False, force_multi_step=False))
    _check(out_s, ref, "split")

    # Batch-uniform timestep fast path.
    t0 = 37
    out_u = jax.block_until_ready(mlp_diffusion_forward_uniform_t(x, t0, prep))
    ref_u = reference_forward(x, jnp.full((B,), t0, jnp.int32), params)
    _check(out_u, ref_u, "uniform-t")

    print("KERNEL_OK")
</pallas_src>

<mosaic_0001>
module attributes {stable_mosaic.version = 11 : i64} {
  func.func @mlp_diffusion_kernel_fused(%arg0: i32, %arg1: memref<152x1xi32, #tpu.memory_space<vmem>>, %arg2: memref<152x128xf32, #tpu.memory_space<vmem>>, %arg3: memref<256x384xbf16, #tpu.memory_space<vmem>>, %arg4: memref<128x128xbf16, #tpu.memory_space<vmem>>, %arg5: memref<128x128xbf16, #tpu.memory_space<vmem>>, %arg6: memref<128x128xbf16, #tpu.memory_space<vmem>>, %arg7: memref<1x128xf32, #tpu.memory_space<vmem>>, %arg8: memref<152x128xbf16, #tpu.memory_space<vmem>>) attributes {dimension_semantics = [#tpu.dimension_semantics<parallel>], iteration_bounds = array<i64: 2>, scalar_prefetch = 0 : i64, scratch_operands = 0 : i64, tpu.core_type = #tpu.core_type<tc>, window_params = [{transform_indices = @transform_0, window_bounds = array<i64: 152, 1>}, {transform_indices = @transform_1, window_bounds = array<i64: 152, 128>}, {pipeline_mode = #tpu.pipeline_mode<synchronous>, transform_indices = @transform_2, window_bounds = array<i64: 256, 384>}, {pipeline_mode = #tpu.pipeline_mode<synchronous>, transform_indices = @transform_3, window_bounds = array<i64: 128, 128>}, {pipeline_mode = #tpu.pipeline_mode<synchronous>, transform_indices = @transform_4, window_bounds = array<i64: 128, 128>}, {pipeline_mode = #tpu.pipeline_mode<synchronous>, transform_indices = @transform_5, window_bounds = array<i64: 128, 128>}, {pipeline_mode = #tpu.pipeline_mode<synchronous>, transform_indices = @transform_6, window_bounds = array<i64: 1, 128>}, {transform_indices = @transform_7, window_bounds = array<i64: 152, 128>}]} {
    %c0 = arith.constant 0 : index
    %c0_0 = arith.constant 0 : index
    %0 = vector.load %arg2[%c0, %c0_0] : memref<152x128xf32, #tpu.memory_space<vmem>>, vector<152x128xf32>
    %1 = arith.truncf %0 : vector<152x128xf32> to vector<152x128xbf16>
    %c0_1 = arith.constant 0 : index
    %c0_2 = arith.constant 0 : index
    %2 = vector.load %arg1[%c0_1, %c0_2] : memref<152x1xi32, #tpu.memory_space<vmem>>, vector<152x1xi32>
    %3 = tpu.iota {dimensions = array<i32: 1>} : vector<152x128xi32>
    %4 = vector.broadcast %2 : vector<152x1xi32> to vector<152x128xi32>
    %5 = arith.cmpi eq, %3, %4 : vector<152x128xi32>
    %6 = arith.extui %5 : vector<152x128xi1> to vector<152x128xi32>
    %7 = arith.sitofp %6 : vector<152x128xi32> to vector<152x128xf32>
    %8 = arith.truncf %7 : vector<152x128xf32> to vector<152x128xbf16>
    %9 = tpu.concatenate %1, %8 in 1 : vector<152x128xbf16>, vector<152x128xbf16> -> vector<152x256xbf16>
    %c0_3 = arith.constant 0 : index
    %c0_4 = arith.constant 0 : index
    %10 = vector.load %arg3[%c0_3, %c0_4] : memref<256x384xbf16, #tpu.memory_space<vmem>>, vector<256x384xbf16>
    %cst = arith.constant dense<0.000000e+00> : vector<152x384xf32>
    %11 = tpu.matmul %9, %10, %cst {dimension_numbers = #tpu.dot_dimension_numbers<[1], [0], [0], [1], [0, 0, 1, 1], [], []>} : vector<152x256xbf16>, vector<256x384xbf16>, vector<152x384xf32> -> vector<152x384xf32>
    %12 = vector.extract_strided_slice %11 {offsets = [0, 0], sizes = [152, 128], strides = [1, 1]} : vector<152x384xf32> to vector<152x128xf32>
    %cst_5 = arith.constant 0.000000e+00 : f32
    %13 = vector.broadcast %cst_5 : f32 to vector<152x128xf32>
    %14 = arith.maximumf %12, %13 : vector<152x128xf32>
    %15 = vector.extract_strided_slice %11 {offsets = [0, 128], sizes = [152, 128], strides = [1, 1]} : vector<152x384xf32> to vector<152x128xf32>
    %16 = vector.extract_strided_slice %11 {offsets = [0, 256], sizes = [152, 128], strides = [1, 1]} : vector<152x384xf32> to vector<152x128xf32>
    %17 = arith.truncf %14 : vector<152x128xf32> to vector<152x128xbf16>
    %c0_6 = arith.constant 0 : index
    %c0_7 = arith.constant 0 : index
    %18 = vector.load %arg4[%c0_6, %c0_7] : memref<128x128xbf16, #tpu.memory_space<vmem>>, vector<128x128xbf16>
    %cst_8 = arith.constant dense<0.000000e+00> : vector<152x128xf32>
    %19 = tpu.matmul %17, %18, %cst_8 {dimension_numbers = #tpu.dot_dimension_numbers<[1], [0], [0], [1], [0, 0, 1, 1], [], []>} : vector<152x128xbf16>, vector<128x128xbf16>, vector<152x128xf32> -> vector<152x128xf32>
    %20 = arith.addf %19, %15 : vector<152x128xf32>
    %cst_9 = arith.constant 0.000000e+00 : f32
    %21 = vector.broadcast %cst_9 : f32 to vector<152x128xf32>
    %22 = arith.maximumf %20, %21 : vector<152x128xf32>
    %23 = arith.truncf %22 : vector<152x128xf32> to vector<152x128xbf16>
    %c0_10 = arith.constant 0 : index
    %c0_11 = arith.constant 0 : index
    %24 = vector.load %arg5[%c0_10, %c0_11] : memref<128x128xbf16, #tpu.memory_space<vmem>>, vector<128x128xbf16>
    %cst_12 = arith.constant dense<0.000000e+00> : vector<152x128xf32>
    %25 = tpu.matmul %23, %24, %cst_12 {dimension_numbers = #tpu.dot_dimension_numbers<[1], [0], [0], [1], [0, 0, 1, 1], [], []>} : vector<152x128xbf16>, vector<128x128xbf16>, vector<152x128xf32> -> vector<152x128xf32>
    %26 = arith.addf %25, %16 : vector<152x128xf32>
    %cst_13 = arith.constant 0.000000e+00 : f32
    %27 = vector.broadcast %cst_13 : f32 to vector<152x128xf32>
    %28 = arith.maximumf %26, %27 : vector<152x128xf32>
    %29 = arith.truncf %28 : vector<152x128xf32> to vector<152x128xbf16>
    %c0_14 = arith.constant 0 : index
    %c0_15 = arith.constant 0 : index
    %30 = vector.load %arg6[%c0_14, %c0_15] : memref<128x128xbf16, #tpu.memory_space<vmem>>, vector<128x128xbf16>
    %cst_16 = arith.constant dense<0.000000e+00> : vector<152x128xf32>
    %31 = tpu.matmul %29, %30, %cst_16 {dimension_numbers = #tpu.dot_dimension_numbers<[1], [0], [0], [1], [0, 0, 1, 1], [], []>} : vector<152x128xbf16>, vector<128x128xbf16>, vector<152x128xf32> -> vector<152x128xf32>
    %c0_17 = arith.constant 0 : index
    %c0_18 = arith.constant 0 : index
    %32 = vector.load %arg7[%c0_17, %c0_18] : memref<1x128xf32, #tpu.memory_space<vmem>>, vector<1x128xf32>
    %33 = vector.broadcast %32 : vector<1x128xf32> to vector<152x128xf32>
    %34 = arith.addf %31, %33 : vector<152x128xf32>
    %cst_19 = arith.constant 0.000000e+00 : f32
    %35 = vector.broadcast %cst_19 : f32 to vector<152x128xf32>
    %36 = arith.maximumf %34, %35 : vector<152x128xf32>
    %37 = arith.truncf %36 : vector<152x128xf32> to vector<152x128xbf16>
    %c0_20 = arith.constant 0 : index
    %c0_21 = arith.constant 0 : index
    %38 = vector.load %arg8[%c0_20, %c0_21] : memref<152x128xbf16, #tpu.memory_space<vmem>>, vector<152x128xbf16>
    tpu.vector_store %arg8[%c0_20, %c0_21], %37 {strides = array<i32>} : memref<152x128xbf16, #tpu.memory_space<vmem>>, vector<152x128xbf16>,
    return
  }
  func.func @transform_0(%arg0: i32) -> (i32, i32) {
    %c0_i32 = arith.constant 0 : i32
    %c0_i32_0 = arith.constant 0 : i32
    return %arg0, %c0_i32 : i32, i32
  }
  func.func @transform_1(%arg0: i32) -> (i32, i32) {
    %c0_i32 = arith.constant 0 : i32
    %c0_i32_0 = arith.constant 0 : i32
    return %arg0, %c0_i32 : i32, i32
  }
  func.func @transform_2(%arg0: i32) -> (i32, i32) {
    %c0_i32 = arith.constant 0 : i32
    %c0_i32_0 = arith.constant 0 : i32
    %c0_i32_1 = arith.constant 0 : i32
    return %c0_i32, %c0_i32_0 : i32, i32
  }
  func.func @transform_3(%arg0: i32) -> (i32, i32) {
    %c0_i32 = arith.constant 0 : i32
    %c0_i32_0 = arith.constant 0 : i32
    %c0_i32_1 = arith.constant 0 : i32
    return %c0_i32, %c0_i32_0 : i32, i32
  }
  func.func @transform_4(%arg0: i32) -> (i32, i32) {
    %c0_i32 = arith.constant 0 : i32
    %c0_i32_0 = arith.constant 0 : i32
    %c0_i32_1 = arith.constant 0 : i32
    return %c0_i32, %c0_i32_0 : i32, i32
  }
  func.func @transform_5(%arg0: i32) -> (i32, i32) {
    %c0_i32 = arith.constant 0 : i32
    %c0_i32_0 = arith.constant 0 : i32
    %c0_i32_1 = arith.constant 0 : i32
    return %c0_i32, %c0_i32_0 : i32, i32
  }
  func.func @transform_6(%arg0: i32) -> (i32, i32) {
    %c0_i32 = arith.constant 0 : i32
    %c0_i32_0 = arith.constant 0 : i32
    %c0_i32_1 = arith.constant 0 : i32
    return %c0_i32, %c0_i32_0 : i32, i32
  }
  func.func @transform_7(%arg0: i32) -> (i32, i32) {
    %c0_i32 = arith.constant 0 : i32
    %c0_i32_0 = arith.constant 0 : i32
    return %arg0, %c0_i32 : i32, i32
  }
}

</mosaic_0001>

<bundles_post_ra>
// kernel: _mlp_diffusion_forward_impl.1
= control target key start
LH: loop header
LB: loop body
LE: loop exit
PB: predicated region body
PF: predicated region fallthrough
CT: control target
= control target key end

     0   :  { %s3664_s0 = inlined_call_operand.hbm [shape: s32[304,1], index: 0, kind: input, shape index: {}]   ;;  %s3665_s1 = inlined_call_operand.hbm [shape: f32[304,128], index: 1, kind: input, shape index: {}]   ;;  %s3666_s2 = inlined_call_operand.hbm [shape: bf16[256,384], index: 2, kind: input, shape index: {}]   ;;  %s3667_s3 = inlined_call_operand.hbm [shape: bf16[128,128], index: 3, kind: input, shape index: {}]   ;;  %s3668_s4 = inlined_call_operand.hbm [shape: bf16[128,128], index: 4, kind: input, shape index: {}]   ;;  %s3669_s5 = inlined_call_operand.hbm [shape: bf16[128,128], index: 5, kind: input, shape index: {}]   ;;  %s3670_s6 = inlined_call_operand.hbm [shape: f32[1,128], index: 6, kind: input, shape index: {}]   ;;  %s3671_s7 = inlined_call_operand.hbm [shape: bf16[304,128], index: 7, kind: output, shape index: {}]  }
   0x1   :  { %3676 = sst [smem:[#allocation21_spill]] %s3664_s0 }
   0x2   :  { %3677 = sst [smem:[#allocation22_spill]] %s3666_s2 }
   0x3   :  { %3678 = sst [smem:[#allocation23_spill]] %s3667_s3 }
   0x4   :  { %3679 = sst [smem:[#allocation24_spill]] %s3668_s4 }
   0x5   :  { %12 = vsyncpa [#allocation3], 0 }
   0x6   :  { %14 = vsyncpa [#allocation3 + $0x1], 0 }
   0x7   :  { %15 = vsyncpa [#allocation6], 0 }
   0x8   :  { %17 = vsyncpa [#allocation6 + $0x1], 0 }
   0x9   :  { %18 = vsyncpa [#allocation9], 0 }
   0xa   :  { %19 = vsyncpa [#allocation12], 0 }
   0xb   :  { %20 = vsyncpa [#allocation4], 0 }
   0xc   :  { %22 = vsyncpa [#allocation4 + $0x1], 0  ;;  %s3073_s24 = smov 0   ;;  %s3075_s25 = smov 0  }
   0xd   :  { %s3077_s26 = smov 0   ;;  %s3079_s27 = smov 0  }
   0xe LB: > { %s3015_s28 = smov [#allocation7]   ;;  %s3094_s30 = sadd.s32 4294967295, %s3013_s27   ;;  %s3013_s27 = sphi %s3079_s27, %s3706_s27   ;;  %s3009_s26 = sphi %s3077_s26, %s3705_s26   ;;  %s3005_s25 = sphi %s3075_s25, %s3704_s25   ;;  %s3001_s24 = sphi %s3073_s24, %s3703_s24  }
   0xf   : > { %s228_s29 = sshll.u32 %s3015_s28, 4  ;;  %p2043_p0 = scmp.ge.s32.totalorder %s3013_s27, 1  ;;  %s3099_s29 = int_to_ptr.vmem [resolvable:$true] %s228_s29 }
  0x10   : > { %p3672_p1 = scmp.eq.s32.totalorder %s3094_s30, 0  ;;  %p216_p2 = scmp.lt.s32.totalorder %s3013_s27, 3 }
  0x11   : > { %s3016_s9 = smov [#allocation8]   ;;  %s3017_s12 = smov [#allocation11]  }
  0x12   : > { %p3101_p3 = pnand %p2043_p0, %p216_p2  ;;  %s241_s10 = sshll.u32 %s3016_s9, 4  ;;  %s3114_s10 = int_to_ptr.vmem [resolvable:$true] %s241_s10 }
  0x13   : > { %s3116_s13 = sshll.u32 %s3017_s12, 4  ;;  %s3682_s2 = sld [smem:[#allocation22_spill]]  ;;  %s268_s13 = int_to_ptr.vmem [resolvable:$true] %s3116_s13 }
  0x14   : > { %s3680_s8 = scalar_select %p3101_p3, 1, 0 }
  0x15   : > { %p2555_p5 = pneg %p3101_p3 }
  0x17   : > { %p3110_p6 = pnand %p2555_p5, %p3672_p1 }
  0x19   : > { %s2731_s16 = scalar_lea.hbm %s3682_s2, 6144  ;;  %p3126_p8 = pneg %p3110_p6 }
  0x1a   : > { %p2732_p7 = scmp.ne.s32.totalorder %s3682_s2, %s2731_s16  ;;  %p2738_p11 = scmp.lt.u32.totalorder %s2731_s16, %s3682_s2 }
  0x1c   : > { %p2734_p9 = pnand %p3126_p8, %p2732_p7 }
  0x1e   : > { %p2735_p10 = pneg %p2734_p9 }
  0x20   : > { %p2740_p12 = pnand %p2738_p11, %p2735_p10 }
  0x22   : > { %2743 = shalt.err (!%p2740_p12)
}
  0x23   : > { %s2744_s22 = scalar_lea.vmem %s3099_s29, 6144  ;;  %p2752_p5 = scmp.lt.s32.totalorder %s3099_s29, %s3099_s29 }
  0x24   : > { %p2745_p13 = scmp.ne.s32.totalorder %s3099_s29, %s2744_s22  ;;  %p2753_p4 = scmp.lt.s32.totalorder %s2744_s22, %s2744_s22 }
  0x26   : > { %p2747_p0 = pnand %p2745_p13, %p3126_p8  ;;  %p2754_p7 = por %p2753_p4, %p2752_p5 }
  0x28   : > { %p2748_p2 = pneg %p2747_p0 }
  0x2a   : > { %p2755_p9 = pnand %p2754_p7, %p2748_p2 }
  0x2c   : > { %2758 = shalt.err (!%p2755_p9)
}
  0x2d   : > { %s3018_s23 = smov 192   ;;  %s3019_s28 = smov 12  }
  0x2e   : > { %2558 = dma.hbm_to_vmem [thread:$0]  (!%p3110_p6), %s3682_s2, 6144, %s3099_s29, [#allocation6], %s3018_s23, %s3018_s23, %s3019_s28  }
  0x2f   : > { %s3684_s3 = sld [smem:[#allocation23_spill]] }
  0x35   : > { %s2759_s16 = scalar_lea.hbm %s3684_s3, 1024 }
  0x36   : > { %p2760_p4 = scmp.ne.s32.totalorder %s3684_s3, %s2759_s16  ;;  %p2766_p12 = scmp.lt.u32.totalorder %s2759_s16, %s3684_s3 }
  0x38   : > { %p2762_p10 = pnand %p2760_p4, %p3126_p8 }
  0x3a   : > { %p2763_p11 = pneg %p2762_p10 }
  0x3c   : > { %p2768_p13 = pnand %p2766_p12, %p2763_p11 }
  0x3e   : > { %2771 = shalt.err (!%p2768_p13)
}
  0x3f   : > { %s2772_s29 = scalar_lea.vmem %s3114_s10, 1024  ;;  %p2780_p7 = scmp.lt.s32.totalorder %s3114_s10, %s3114_s10 }
  0x40   : > { %p2773_p0 = scmp.ne.s32.totalorder %s3114_s10, %s2772_s29  ;;  %p2781_p9 = scmp.lt.s32.totalorder %s2772_s29, %s2772_s29 }
  0x42   : > { %p2775_p2 = pnand %p2773_p0, %p3126_p8  ;;  %p2782_p4 = por %p2781_p9, %p2780_p7 }
  0x44   : > { %p2776_p5 = pneg %p2775_p2 }
  0x46   : > { %p2783_p10 = pnand %p2782_p4, %p2776_p5 }
  0x48   : > { %2786 = shalt.err (!%p2783_p10)
}
  0x49   : > { %s3020_s22 = smov 64   ;;  %s3021_s23 = smov 4  }
  0x4a   : > { %2561 = dma.hbm_to_vmem [thread:$0]  (!%p3110_p6), %s3684_s3, 1024, %s3114_s10, [#allocation9], %s3020_s22, %s3020_s22, %s3021_s23  }
  0x4b   : > { %s2787_s15 = scalar_lea.hbm %s3669_s5, 1024 }
  0x4c   : > { %p2788_p11 = scmp.ne.s32.totalorder %s3669_s5, %s2787_s15  ;;  %p2794_p0 = scmp.lt.u32.totalorder %s2787_s15, %s3669_s5 }
  0x4e   : > { %p2790_p12 = pnand %p2788_p11, %p3126_p8 }
  0x50   : > { %p2791_p13 = pneg %p2790_p12 }
  0x52   : > { %p2796_p2 = pnand %p2794_p0, %p2791_p13 }
  0x54   : > { %2799 = shalt.err (!%p2796_p2)
}
  0x55   : > { %s2800_s21 = scalar_lea.vmem %s268_s13, 1024  ;;  %p2808_p4 = scmp.lt.s32.totalorder %s268_s13, %s268_s13 }
  0x56   : > { %p2801_p5 = scmp.ne.s32.totalorder %s268_s13, %s2800_s21  ;;  %p2809_p10 = scmp.lt.s32.totalorder %s2800_s21, %s2800_s21 }
  0x58   : > { %p2803_p7 = pnand %p2801_p5, %p3126_p8  ;;  %p2810_p1 = por %p2809_p10, %p2808_p4 }
  0x5a   : > { %p2804_p9 = pneg %p2803_p7 }
  0x5c   : > { %p2811_p3 = pnand %p2810_p1, %p2804_p9 }
  0x5e   : > { %2814 = shalt.err (!%p2811_p3)
}
  0x5f   : > { %2567 = dma.hbm_to_vmem [thread:$0]  (!%p3110_p6), %s3669_s5, 1024, %s268_s13, [#allocation12], %s3020_s22, %s3020_s22, %s3021_s23  }
  0x60   : > { %s3022_s28 = smov [#allocation10]   ;;  %s3023_s12 = smov [#allocation13]  }
  0x61   : > { %s254_s9 = sshll.u32 %s3022_s28, 4  ;;  %s281_s14 = sshll.u32 %s3023_s12, 4  ;;  %s255_s9 = int_to_ptr.vmem [resolvable:$true] %s254_s9  ;;  %s282_s14 = int_to_ptr.vmem [resolvable:$true] %s281_s14 }
  0x62   : > { %s3685_s4 = sld [smem:[#allocation24_spill]] }
  0x68   : > { %s2815_s17 = scalar_lea.hbm %s3685_s4, 1024 }
  0x69   : > { %p2816_p1 = scmp.ne.s32.totalorder %s3685_s4, %s2815_s17  ;;  %p2822_p12 = scmp.lt.u32.totalorder %s2815_s17, %s3685_s4 }
  0x6b   : > { %p2818_p3 = pnand %p2816_p1, %p3126_p8 }
  0x6d   : > { %p2819_p11 = pneg %p2818_p3 }
  0x6f   : > { %p2824_p13 = pnand %p2822_p12, %p2819_p11 }
  0x71   : > { %2827 = shalt.err (!%p2824_p13)
}
  0x72   : > { %s2828_s13 = scalar_lea.vmem %s255_s9, 1024  ;;  %p2836_p7 = scmp.lt.s32.totalorder %s255_s9, %s255_s9 }
  0x73   : > { %p2829_p0 = scmp.ne.s32.totalorder %s255_s9, %s2828_s13  ;;  %p2837_p9 = scmp.lt.s32.totalorder %s2828_s13, %s2828_s13 }
  0x75   : > { %p2831_p2 = pnand %p2829_p0, %p3126_p8  ;;  %p2838_p4 = por %p2837_p9, %p2836_p7 }
  0x77   : > { %p2832_p5 = pneg %p2831_p2 }
  0x79   : > { %p2839_p10 = pnand %p2838_p4, %p2832_p5 }
  0x7b   : > { %2842 = shalt.err (!%p2839_p10)
}
  0x7c   : > { %2564 = dma.hbm_to_vmem [thread:$0]  (!%p3110_p6), %s3685_s4, 1024, %s255_s9, [#allocation9], %s3020_s22, %s3020_s22, %s3021_s23  }
  0x7d   : > { %s2843_s16 = scalar_lea.hbm %s3670_s6, 16 }
  0x7e   : > { %p2844_p1 = scmp.ne.s32.totalorder %s3670_s6, %s2843_s16  ;;  %p2850_p12 = scmp.lt.u32.totalorder %s2843_s16, %s3670_s6 }
  0x80   : > { %p2846_p3 = pnand %p2844_p1, %p3126_p8 }
  0x82   : > { %p2847_p11 = pneg %p2846_p3 }
  0x84   : > { %p2852_p13 = pnand %p2850_p12, %p2847_p11 }
  0x86   : > { %2855 = shalt.err (!%p2852_p13)
}
  0x87   : > { %s2856_s10 = scalar_lea.vmem %s282_s14, 16  ;;  %s2863_s22 = scalar_lea.vmem %s282_s14, 32 }
  0x88   : > { %p2857_p0 = scmp.ne.s32.totalorder %s282_s14, %s2856_s10  ;;  %p2864_p7 = scmp.lt.s32.totalorder %s282_s14, %s282_s14 }
  0x89   : > { %p2865_p9 = scmp.lt.s32.totalorder %s2863_s22, %s2856_s10 }
  0x8a   : > { %p2859_p2 = pnand %p2857_p0, %p3126_p8 }
  0x8b   : > { %p2866_p4 = por %p2865_p9, %p2864_p7 }
  0x8c   : > { %p2860_p5 = pneg %p2859_p2 }
  0x8e   : > { %p2867_p10 = pnand %p2866_p4, %p2860_p5 }
  0x90   : > { %2870 = shalt.err (!%p2867_p10)
}
  0x91   : > { %2570 = dma.hbm_to_vmem [thread:$0]  (!%p3110_p6), %s3670_s6, 16, %s282_s14, [#allocation12]  }
  0x92   : > { %s2042_s19 = sadd.s32 4294967294, %s3013_s27   ;;  %s3236_s11 = sadd.s32 1, %s3013_s27  }
  0x93   : > { %s35_s13 = sadd.s32 1, %s3009_s26  ;;  %s32_s29 = ssub.s32 %s3013_s27, %s3236_s11 }
  0x94   : > { %p42_p8 = scmp.ne.s32.totalorder %s3009_s26, %s3005_s25  ;;  %p33_p1 = scmp.eq.s32.totalorder %s32_s29, 0 }
  0x95   : > { %p43_p3 = scmp.eq.s32.totalorder %s3013_s27, 0  ;;  %p48_p11 = scmp.ne.s32.totalorder %s3005_s25, %s3001_s24 }
  0x96   : > { %p203_p12 = scmp.eq.s32.totalorder %s3094_s30, 1  ;;  %p3686_p0 = scmp.eq.s32.totalorder %s3094_s30, 0 }
  0x97   : > { %s3248_s28 = scalar_select %p33_p1, %s3009_s26, %s35_s13  }
  0x98   : > { %p44_p13 = por %p43_p3, %p42_p8  ;;  %p3252_p2 = por %p3686_p0, %p48_p11 }
  0x99   : > { %p3256_p6 = por %p203_p12, %p42_p8  ;;  %p209_p5 = scmp.eq.s32.totalorder %s2042_s19, 1 }
  0x9a   : > { %p2587_p7 = scmp.lt.s32.totalorder %s3013_s27, 2  ;;  %s292_s15 = sand.u32 1, %s3009_s26  }
  0x9b   : > { %s3688_s12 = scalar_select %p3256_p6, 1, 0 }
  0x9c   : > { %p3262_p9 = por %p209_p5, %p48_p11  ;;  %s3266_s17 = smul.u32 152, %s292_s15 }
  0x9d   : > { %p3268_p4 = pnand %p2587_p7, %p44_p13  ;;  %s3674_s20 = smul.u32 2432, %s3013_s27 }
  0x9e   : > { %s3689_s16 = scalar_select %p3262_p9, 1, 0 }
  0x9f   : > { %s3691_s0 = sld [smem:[#allocation21_spill]]  ;;  %s296_s23 = scalar_lea.vmem [#allocation2], %s3266_s17 }
  0xa0   : > { %s303_s9 = sshll.u32 %s296_s23, 4  ;;  %s3283_s19 = scalar_lea.sflag [#allocation3], %s292_s15  ;;  %s3281_s9 = int_to_ptr.vmem [resolvable:$true] %s303_s9 }
  0xa1   : > { %p2873_p8 = pneg %p3268_p4 }
  0xa5   : > { %s3278_s22 = scalar_lea.hbm %s3691_s0, %s3674_s20  ;;  %s2876_s10 = scalar_lea.hbm %s3691_s0, 4864 }
  0xa6   : > { %s2871_s13 = scalar_lea.hbm %s3278_s22, 2432  ;;  %p2877_p11 = scmp.lt.u32.totalorder %s3278_s22, %s3691_s0 }
  0xa7   : > { %p2872_p10 = scmp.ne.s32.totalorder %s3278_s22, %s2871_s13  ;;  %p2878_p12 = scmp.lt.u32.totalorder %s2876_s10, %s2871_s13 }
  0xa8   : > { %p2880_p0 = scmp.lt.u32.totalorder %s2871_s13, %s3278_s22 }
  0xa9   : > { %p2874_p1 = pnand %p2873_p8, %p2872_p10  ;;  %p2879_p13 = por %p2878_p12, %p2877_p11 }
  0xab   : > { %p2875_p3 = pneg %p2874_p1  ;;  %p2881_p5 = por %p2880_p0, %p2879_p13 }
  0xad   : > { %p2882_p7 = pnand %p2881_p5, %p2875_p3 }
  0xaf   : > { %2885 = shalt.err (!%p2882_p7)
}
  0xb0   : > { %s2886_s15 = scalar_lea.vmem %s3281_s9, 2432  ;;  %s3024_s23 = smov [#allocation2]  }
  0xb1   : > { %p2887_p10 = scmp.ne.s32.totalorder %s3281_s9, %s2886_s15  ;;  %s2891_s29 = sshll.u32 %s3024_s23, 4  ;;  %s2892_s29 = int_to_ptr.vmem [resolvable:$false] %s2891_s29 }
  0xb2   : > { %s2893_s2 = scalar_lea.vmem %s2892_s29, 4864  ;;  %p2894_p6 = scmp.lt.s32.totalorder %s3281_s9, %s2892_s29 }
  0xb3   : > { %p2889_p1 = pnand %p2887_p10, %p2873_p8  ;;  %p2895_p11 = scmp.lt.s32.totalorder %s2893_s2, %s2886_s15 }
  0xb5   : > { %p2890_p9 = pneg %p2889_p1  ;;  %p2896_p12 = por %p2895_p11, %p2894_p6 }
  0xb7   : > { %p2897_p13 = pnand %p2896_p12, %p2890_p9 }
  0xb9   : > { %2900 = shalt.err (!%p2897_p13)
}
  0xba   : > { %s3025_s20 = smov 128   ;;  %s3026_s13 = smov 8  }
  0xbb   : > { %2574 = dma.hbm_to_vmem [thread:$0]  (!%p3268_p4), %s3278_s22, 2432, %s3281_s9, %s3283_s19, %s3025_s20, %s3025_s20, %s3026_s13  }
  0xbc   : > { %s313_s21 = sand.u32 1, %s3013_s27   ;;  %s3692_s10 = smul.u32 2432, %s3013_s27 }
  0xbd   : > { %s317_s2 = scalar_lea.vmem [#allocation5], %s3266_s17  ;;  %s3325_s3 = scalar_lea.sflag [#allocation6], %s313_s21 }
  0xbe   : > { %s3320_s29 = scalar_lea.hbm %s3665_s1, %s3692_s10  ;;  %s324_s0 = sshll.u32 %s317_s2, 4  ;;  %s3323_s0 = int_to_ptr.vmem [resolvable:$true] %s324_s0 }
  0xbf   : > { %s2901_s4 = scalar_lea.hbm %s3320_s29, 2432  ;;  %s2906_s19 = scalar_lea.hbm %s3665_s1, 4864 }
  0xc0   : > { %p2902_p6 = scmp.ne.s32.totalorder %s3320_s29, %s2901_s4  ;;  %p2907_p0 = scmp.lt.u32.totalorder %s3320_s29, %s3665_s1 }
  0xc1   : > { %p2908_p5 = scmp.lt.u32.totalorder %s2906_s19, %s2901_s4  ;;  %p2910_p10 = scmp.lt.u32.totalorder %s2901_s4, %s3320_s29 }
  0xc2   : > { %p2904_p9 = pnand %p2902_p6, %p2873_p8 }
  0xc3   : > { %p2909_p7 = por %p2908_p5, %p2907_p0 }
  0xc4   : > { %p2905_p3 = pneg %p2904_p9 }
  0xc5   : > { %p2911_p1 = por %p2910_p10, %p2909_p7 }
  0xc7   : > { %p2912_p11 = pnand %p2911_p1, %p2905_p3 }
  0xc9   : > { %2915 = shalt.err (!%p2912_p11)
}
  0xca   : > { %s2916_s17 = scalar_lea.vmem %s3323_s0, 2432  ;;  %s3027_s21 = smov [#allocation5]  }
  0xcb   : > { %p2917_p12 = scmp.ne.s32.totalorder %s3323_s0, %s2916_s17  ;;  %s2921_s23 = sshll.u32 %s3027_s21, 4  ;;  %s2922_s23 = int_to_ptr.vmem [resolvable:$false] %s2921_s23 }
  0xcc   : > { %s2923_s2 = scalar_lea.vmem %s2922_s23, 4864  ;;  %p2924_p9 = scmp.lt.s32.totalorder %s3323_s0, %s2922_s23 }
  0xcd   : > { %p2919_p13 = pnand %p2917_p12, %p2873_p8  ;;  %p2925_p0 = scmp.lt.s32.totalorder %s2923_s2, %s2916_s17 }
  0xcf   : > { %p2920_p6 = pneg %p2919_p13  ;;  %p2926_p5 = por %p2925_p0, %p2924_p9 }
  0xd1   : > { %p2927_p7 = pnand %p2926_p5, %p2920_p6 }
  0xd3   : > { %2930 = shalt.err (!%p2927_p7)
}
  0xd4   : > { %2577 = dma.hbm_to_vmem [thread:$0]  (!%p3268_p4), %s3320_s29, 2432, %s3323_s0, %s3325_s3, %s3025_s20, %s3025_s20, %s3026_s13  }
  0xd5   : > { %p3693_p8 = scmp.ne.s32.totalorder %s3680_s8, 0 }
  0xd6   : > { %s3357_s4 = sand.u32 (!%p3693_p8), 1, %s3005_s25  }
  0xd7   : > { %336 = sbr.rel (%p3693_p8) target bundleno = 1342 (0x53e), region = 48  ;;  %s339_s9 = scalar_lea.sflag (!%p3693_p8), [#allocation3], %s3357_s4 }
  0xd8   : > { %s2527_s22 = smul.u32 (!%p3693_p8), 152, %s3357_s4 }
  0xda   : > { %s3361_s19 = scalar_lea.vmem (!%p3693_p8), [#allocation2], %s2527_s22 }
  0xde   : > { %2976 = dma.done.wait (%p3252_p2), %s339_s9, 2432  }
  0xdf   : > { %2978 = vsyncadd (%p3252_p2), %s339_s9, 4294964864  ;;  %s347_s0 = sand.u32 1, %s3094_s30   ;;  %s3368_s8 = scalar_lea.vmem [#allocation5], %s2527_s22 }
  0xe0   : > { %s348_s3 = scalar_lea.sflag [#allocation6], %s347_s0 }
  0xe1   : > { %2980 = dma.done.wait (%p3252_p2), %s348_s3, 2432  }
  0xe2   : > { %2982 = vsyncadd (%p3252_p2), %s348_s3, 4294964864  ;;  %p3694_p4 = scmp.eq.s32.totalorder %s3094_s30, 0 }
  0xe4   : > { %2984 = dma.done.wait (%p3694_p4), [#allocation6], 6144   ;;  %p3695_p3 = pmov %p3694_p4 }
  0xe6   : > { %2986 = vsyncadd (%p3695_p3), [#allocation6], 4294961152  ;;  %p3696_p10 = pmov %p3695_p3 }
  0xe7   : > { %p3697_p1 = pmov %p3695_p3 }
  0xe8   : > { %2988 = dma.done.wait (%p3696_p10), [#allocation9], 2048  }
  0xe9   : > { %2990 = vsyncadd (%p3697_p1), [#allocation9], 4294965248  ;;  %p3698_p11 = pmov %p3697_p1 }
  0xea   : > { %p3699_p12 = pmov %p3697_p1 }
  0xeb   : > { %2992 = dma.done.wait (%p3698_p11), [#allocation12], 1040  }
  0xec   : > { %2994 = vsyncadd (%p3699_p12), [#allocation12], 4294966256  ;;  %v3028_v0 = vmov 0   ;;  %v442_v1 = vld [vmem:[%s3361_s19 + $0x10] sm:$0xff]  ;;  %v440_v2 = vld [vmem:[%s3361_s19] sm:$0xff]  ;;  %s2528_s14 = smul.u32 76, %s3357_s4 }
  0xed   : > { %2642 = vset.pattern.permute.xlu1 %v3028_v0  ;;  %2641 = vset.pattern.permute.xlu0 %v3028_v0  ;;  %v443_v3 = vld [vmem:[%s3361_s19 + $0x18] sm:$0xff]  ;;  %v441_v4 = vld [vmem:[%s3361_s19 + $0x8] sm:$0xff]  ;;  %v444_v6 = vld [vmem:[%s3361_s19 + $0x20] sm:$0xff]  ;;  %s2233_s20 = smul.u32 1216, %s3094_s30  ;;  %s1886_s30 = scalar_lea.sflag [#allocation4], %s3357_s4 }
  0xee   : > { %468 = vperm.xlu1 %2642, %v442_v1   ;;  %462 = vperm.xlu0 %2641, %v440_v2   ;;  %v445_v5 = vld [vmem:[%s3361_s19 + $0x28] sm:$0xff]  ;;  %v447_v10 = vld [vmem:[%s3361_s19 + $0x38] sm:$0xff]  ;;  %v446_v11 = vld [vmem:[%s3361_s19 + $0x30] sm:$0xff]  ;;  %s3586_s18 = scalar_lea.vmem [#allocation14], %s2528_s14  ;;  %p3700_p13 = scmp.ne.s32.totalorder %s3688_s12, 0 }
  0xef   : > { %v2643_v7 = vld [vmem:[#allocation7 + $0x4] ss:$12 sps:$4 sm:$0xff]   ;;  %v2645_v8 = vld [vmem:[#allocation7] ss:$12 sps:$4 sm:$0xff]   ;;  %v2646_v9 = vld [vmem:[#allocation7 + $0x1c] ss:$12 sps:$4 sm:$0xff]   ;;  %s3617_s15 = scalar_lea.hbm %s3671_s7, %s2233_s20 }
  0xf0   : > { %905 = vmatprep.subr.bf16.mxu0 %v2643_v7  ;;  %v2648_v12 = vld [vmem:[#allocation7 + $0x18] ss:$12 sps:$4 sm:$0xff]   ;;  %v2649_v13 = vld [vmem:[#allocation7 + $0x34] ss:$12 sps:$4 sm:$0xff]   ;;  %v2651_v16 = vld [vmem:[#allocation7 + $0x30] ss:$12 sps:$4 sm:$0xff]  }
  0xf1   : > { %906 = vmatpush1.bf16.msra.mxu0 %v2645_v8  ;;  %v449_v14 = vld [vmem:[%s3361_s19 + $0x48] sm:$0xff]  ;;  %v448_v15 = vld [vmem:[%s3361_s19 + $0x40] sm:$0xff]  ;;  %v451_v17 = vld [vmem:[%s3361_s19 + $0x58] sm:$0xff]  ;;  %s1899_s13 = sshll.u32 %s3586_s18, 4  ;;  %s3030_s21 = smov [#allocation14]   ;;  %s3619_s13 = int_to_ptr.vmem [resolvable:$true] %s1899_s13 }
  0xf2   : > { %471 = vperm.xlu1 %2642, %v443_v3   ;;  %465 = vperm.xlu0 %2641, %v441_v4   ;;  %v450_v18 = vld [vmem:[%s3361_s19 + $0x50] sm:$0xff]  ;;  %v453_v23 = vld [vmem:[%s3361_s19 + $0x68] sm:$0xff]  ;;  %v452_v25 = vld [vmem:[%s3361_s19 + $0x60] sm:$0xff]  ;;  %s2931_s17 = scalar_lea.vmem %s3619_s13, 1216  ;;  %s2935_s23 = sshll.u32 %s3030_s21, 4  ;;  %s2936_s23 = int_to_ptr.vmem [resolvable:$false] %s2935_s23 }
  0xf3   : > { %907 = vmatprep.subr.bf16.mxu0 %v2646_v9  ;;  %v2652_v19 = vld [vmem:[#allocation7 + $0x4c] ss:$12 sps:$4 sm:$0xff]   ;;  %v2654_v20 = vld [vmem:[#allocation7 + $0x48] ss:$12 sps:$4 sm:$0xff]   ;;  %v2655_v22 = vld [vmem:[#allocation7 + $0x64] ss:$12 sps:$4 sm:$0xff]   ;;  %p2932_p2 = scmp.ne.s32.totalorder %s3619_s13, %s2931_s17  ;;  %p2938_p0 = scmp.lt.s32.totalorder %s3619_s13, %s2936_s23 }
  0xf4   : > { %v2669_v21 = vld [vmem:[#allocation7 + $0xc8] ss:$12 sps:$4 sm:$0xff]   ;;  %v2657_v26 = vld [vmem:[#allocation7 + $0x60] ss:$12 sps:$4 sm:$0xff]   ;;  %v2660_v32 = vld [vmem:[#allocation7 + $0x78] ss:$12 sps:$4 sm:$0xff]  }
  0xf5   : > { %908 = vmatpush1.bf16.msra.mxu0 %v2648_v12  ;;  %2287 = vmatprep.subr.bf16.mxu1 %v2669_v21  ;;  %v2671_v24 = vld [vmem:[#allocation7 + $0x8] ss:$12 sps:$4 sm:$0xff]   ;;  %v2674_v27 = vld [vmem:[#allocation7 + $0xe0] ss:$12 sps:$4 sm:$0xff]   ;;  %v2679_v33 = vld [vmem:[#allocation7 + $0xf8] ss:$12 sps:$4 sm:$0xff]   ;;  %p2933_p6 = pnand %p2932_p2, %p3700_p13 }
  0xf6   : > { %477 = vperm.xlu1 %2642, %v445_v5   ;;  %474 = vperm.xlu0 %2641, %v444_v6   ;;  %v2676_v28 = vld [vmem:[#allocation7 + $0x20] ss:$12 sps:$4 sm:$0xff]   ;;  %v455_v29 = vld [vmem:[%s3361_s19 + $0x78] sm:$0xff]  ;;  %v459_v5 = vlaneseq  ;;  %s2937_s2 = scalar_lea.vmem %s2936_s23, 2432 }
  0xf7   : > { %909 = vmatprep.subr.bf16.mxu0 %v2649_v13  ;;  %2288 = vmatpush3.bf16.msra.mxu1 %v2671_v24  ;;  %v454_v30 = vld [vmem:[%s3361_s19 + $0x70] sm:$0xff]  ;;  %v2681_v34 = vld [vmem:[#allocation7 + $0x38] ss:$12 sps:$4 sm:$0xff]   ;;  %p2934_p9 = pneg %p2933_p6  ;;  %p2939_p5 = scmp.lt.s32.totalorder %s2937_s2, %s2931_s17 }
  0xf8   : > { %v2658_v31 = vld [vmem:[#allocation7 + $0x7c] ss:$12 sps:$4 sm:$0xff]   ;;  %2289 = vmatprep.subr.bf16.mxu1 %v2674_v27  ;;  %v2661_v35 = vld [vmem:[#allocation7 + $0x94] ss:$12 sps:$4 sm:$0xff]   ;;  %v2664_v41 = vld [vmem:[#allocation7 + $0xac] ss:$12 sps:$4 sm:$0xff]  }
  0xf9   : > { %910 = vmatpush1.bf16.msra.mxu0 %v2651_v16  ;;  %v457_v36 = vld [vmem:[%s3361_s19 + $0x88] sm:$0xff]  ;;  %v2684_v37 = vld [vmem:[#allocation7 + $0x110] ss:$12 sps:$4 sm:$0xff]   ;;  %v3405_v8 = vand.u32 127, %v459_v5  ;;  %p2940_p7 = por %p2939_p5, %p2938_p0 }
  0xfa   : > { %483 = vperm.xlu1 %2642, %v447_v10   ;;  %480 = vperm.xlu0 %2641, %v446_v11   ;;  %v456_v38 = vld [vmem:[%s3361_s19 + $0x80] sm:$0xff]  ;;  %v2689_v42 = vld [vmem:[#allocation7 + $0x128] ss:$12 sps:$4 sm:$0xff]  }
  0xfb   : > { %911 = vmatprep.subr.bf16.mxu0 %v2652_v19  ;;  %2290 = vmatpush3.bf16.msra.mxu1 %v2676_v28  ;;  %v2686_v39 = vld [vmem:[#allocation7 + $0x50] ss:$12 sps:$4 sm:$0xff]   ;;  %v2691_v44 = vld [vmem:[#allocation7 + $0x68] ss:$12 sps:$4 sm:$0xff]   ;;  %v2694_v46 = vld [vmem:[#allocation7 + $0x140] ss:$12 sps:$4 sm:$0xff]   ;;  %p2941_p8 = pnand %p2940_p7, %p2934_p9 }
  0xfc   : > { %2291 = vmatprep.subr.bf16.mxu1 %v2679_v33  ;;  %v2663_v40 = vld [vmem:[#allocation7 + $0x90] ss:$12 sps:$4 sm:$0xff]   ;;  %v2666_v45 = vld [vmem:[#allocation7 + $0xa8] ss:$12 sps:$4 sm:$0xff]   ;;  %v2670_v48 = vld [vmem:[#allocation7 + $0xc0] ss:$12 sps:$4 sm:$0xff]  }
  0xfd   : > { %912 = vmatpush1.bf16.msra.mxu0 %v2654_v20  ;;  %v458_v43 = vld [vmem:[%s3361_s19 + $0x90] sm:$0xff]  ;;  %v2699_v50 = vld [vmem:[#allocation7 + $0x158] ss:$12 sps:$4 sm:$0xff]  }
  0xfe   : > { %489 = vperm.xlu1 %2642, %v449_v14   ;;  %486 = vperm.xlu0 %2641, %v448_v15   ;;  %v2667_v47 = vld [vmem:[#allocation7 + $0xc4] ss:$12 sps:$4 sm:$0xff]   ;;  %v2696_v49 = vld [vmem:[#allocation7 + $0x80] ss:$12 sps:$4 sm:$0xff]   ;;  %v2672_v51 = vld [vmem:[#allocation7 + $0xdc] ss:$12 sps:$4 sm:$0xff]  }
  0xff   : > { %913 = vmatprep.subr.bf16.mxu0 %v2655_v22  ;;  %2292 = vmatpush3.bf16.msra.mxu1 %v2681_v34  ;;  %v2701_v52 = vld [vmem:[#allocation7 + $0x98] ss:$12 sps:$4 sm:$0xff]   ;;  %v2704_v54 = vld [vmem:[#allocation7 + $0x170] ss:$12 sps:$4 sm:$0xff]   ;;  %v2677_v55 = vld [vmem:[#allocation7 + $0xf4] ss:$12 sps:$4 sm:$0xff]  }
 0x100   : > { %2293 = vmatprep.subr.bf16.mxu1 %v2684_v37  ;;  %v2675_v53 = vld [vmem:[#allocation7 + $0xd8] ss:$12 sps:$4 sm:$0xff]   ;;  %v2706_v56 = vld [vmem:[#allocation7 + $0xb0] ss:$12 sps:$4 sm:$0xff]   ;;  %v2685_v59 = vld [vmem:[#allocation7 + $0x108] ss:$12 sps:$4 sm:$0xff]  }
 0x101   : > { %914 = vmatpush1.bf16.msra.mxu0 %v2657_v26  ;;  %v2680_v57 = vld [vmem:[#allocation7 + $0xf0] ss:$12 sps:$4 sm:$0xff]   ;;  %v2682_v58 = vld [vmem:[#allocation7 + $0x10c] ss:$12 sps:$4 sm:$0xff]   ;;  %v2697_v0 = vld [vmem:[#allocation7 + $0x154] ss:$12 sps:$4 sm:$0xff]  }
 0x102   : > { %495 = vperm.xlu1 %2642, %v451_v17   ;;  %492 = vperm.xlu0 %2641, %v450_v18   ;;  %v2687_v60 = vld [vmem:[#allocation7 + $0x124] ss:$12 sps:$4 sm:$0xff]   ;;  %v2690_v61 = vld [vmem:[#allocation7 + $0x120] ss:$12 sps:$4 sm:$0xff]   ;;  %v2692_v62 = vld [vmem:[#allocation7 + $0x13c] ss:$12 sps:$4 sm:$0xff]  }
 0x103   : > { %915 = vmatprep.subr.bf16.mxu0 %v2658_v31  ;;  %2294 = vmatpush3.bf16.msra.mxu1 %v2686_v39  ;;  %v2695_v63 = vld [vmem:[#allocation7 + $0x138] ss:$12 sps:$4 sm:$0xff]   ;;  %v2700_v1 = vld [vmem:[#allocation7 + $0x150] ss:$12 sps:$4 sm:$0xff]   ;;  %v2705_v3 = vld [vmem:[#allocation7 + $0x168] ss:$12 sps:$4 sm:$0xff]  }
 0x104   : > { %2295 = vmatprep.subr.bf16.mxu1 %v2689_v42  ;;  %v2702_v2 = vld [vmem:[#allocation7 + $0x16c] ss:$12 sps:$4 sm:$0xff]   ;;  %v2707_v4 = vld [vmem:[#allocation8] sm:$0xff]   ;;  %v3029_v14 = vmov 1.0|1.0   ;;  %v2709_v20 = vld [vmem:[#allocation8 + $0x10] sm:$0xff]  }
 0x105   : > { %916 = vmatpush1.bf16.msra.mxu0 %v2660_v32  ;;  %v411_v9 = vld [vmem:[%s3368_s8] sm:$0xff]  ;;  %v412_v10 = vld [vmem:[%s3368_s8 + $0x8] sm:$0xff]  ;;  %v413_v16 = vld [vmem:[%s3368_s8 + $0x10] sm:$0xff] }
 0x106   : > { %501 = vperm.xlu1 %2642, %v453_v23   ;;  %498 = vperm.xlu0 %2641, %v452_v25   ;;  %v430_v13 = vpack.c.bf16 %v412_v10, %v411_v9  ;;  %v2708_v15 = vld [vmem:[#allocation8 + $0x8] sm:$0xff]   ;;  %v2710_v22 = vld [vmem:[#allocation8 + $0x18] sm:$0xff]   ;;  %v2711_v27 = vld [vmem:[#allocation8 + $0x20] sm:$0xff]  }
 0x107   : > { %917 = vmatprep.subr.bf16.mxu0 %v2661_v35  ;;  %2296 = vmatpush3.bf16.msra.mxu1 %v2691_v44  ;;  %v414_v17 = vld [vmem:[%s3368_s8 + $0x18] sm:$0xff]  ;;  %v415_v23 = vld [vmem:[%s3368_s8 + $0x20] sm:$0xff]  ;;  %v416_v24 = vld [vmem:[%s3368_s8 + $0x28] sm:$0xff] }
 0x108   : > { %2297 = vmatprep.subr.bf16.mxu1 %v2694_v46  ;;  %v431_v21 = vpack.c.bf16 %v414_v17, %v413_v16  ;;  %v432_v28 = vpack.c.bf16 %v416_v24, %v415_v23  ;;  %v419_v34 = vld [vmem:[%s3368_s8 + $0x40] sm:$0xff]  ;;  %v420_v35 = vld [vmem:[%s3368_s8 + $0x48] sm:$0xff]  ;;  %v421_v39 = vld [vmem:[%s3368_s8 + $0x50] sm:$0xff] }
 0x109   : > { %918 = vmatpush1.bf16.msra.mxu0 %v2663_v40  ;;  %v422_v40 = vld [vmem:[%s3368_s8 + $0x58] sm:$0xff]  ;;  %v423_v44 = vld [vmem:[%s3368_s8 + $0x60] sm:$0xff] }
 0x10a   : > { %507 = vperm.xlu1 %2642, %v455_v29   ;;  %504 = vperm.xlu0 %2641, %v454_v30   ;;  %v417_v29 = vld [vmem:[%s3368_s8 + $0x30] sm:$0xff]  ;;  %v418_v30 = vld [vmem:[%s3368_s8 + $0x38] sm:$0xff] }
 0x10b   : > { %919 = vmatprep.subr.bf16.mxu0 %v2664_v41  ;;  %2298 = vmatpush3.bf16.msra.mxu1 %v2696_v49  ;;  %v433_v33 = vpack.c.bf16 %v418_v30, %v417_v29  ;;  %v425_v49 = vld [vmem:[%s3368_s8 + $0x70] sm:$0xff] }
 0x10c   : > { %2299 = vmatprep.subr.bf16.mxu1 %v2699_v50  ;;  %v426_v50 = vld [vmem:[%s3368_s8 + $0x78] sm:$0xff] }
 0x10d   : > { %920 = vmatpush1.bf16.msra.mxu0 %v2666_v45  ;;  %v424_v45 = vld [vmem:[%s3368_s8 + $0x68] sm:$0xff] }
 0x10e   : > { %513 = vperm.xlu1 %2642, %v457_v36   ;;  %510 = vperm.xlu0 %2641, %v456_v38   ;;  %v434_v38 = vpack.c.bf16 %v420_v35, %v419_v34 }
 0x10f   : > { %921 = vmatprep.subr.bf16.mxu0 %v2667_v47  ;;  %2300 = vmatpush3.bf16.msra.mxu1 %v2701_v52 }
 0x110   : > { %2301 = vmatprep.subr.bf16.mxu1 %v2704_v54  ;;  %v427_v54 = vld [vmem:[%s3368_s8 + $0x80] sm:$0xff] }
 0x111   : > { %922 = vmatpush1.bf16.msra.mxu0 %v2670_v48  ;;  %v436_v48 = vpack.c.bf16 %v424_v45, %v423_v44 }
 0x112   : > { %516 = vperm.xlu0 %2641, %v458_v43   ;;  %923 = vmatprep.subr.bf16.mxu0 %v2672_v51  ;;  %v435_v43 = vpack.c.bf16 %v422_v40, %v421_v39 }
 0x113   : > { %2302 = vmatpush3.bf16.msra.mxu1 %v2706_v56 }
 0x114   : > { %2417 = vmatprep.subr.bf16.mxu1 %v2707_v4 }
 0x115   : > { %924 = vmatpush1.bf16.msra.mxu0 %v2675_v53  ;;  %v437_v53 = vpack.c.bf16 %v426_v50, %v425_v49 }
 0x116   : > { %925 = vmatprep.subr.bf16.mxu0 %v2677_v55  ;;  %v428_v55 = vld [vmem:[%s3368_s8 + $0x88] sm:$0xff] }
 0x119   : > { %926 = vmatpush1.bf16.msra.mxu0 %v2680_v57  ;;  %v438_v57 = vpack.c.bf16 %v428_v55, %v427_v54 }
 0x11a   : > { %927 = vmatprep.subr.bf16.mxu0 %v2682_v58  ;;  %v429_v58 = vld [vmem:[%s3368_s8 + $0x90] sm:$0xff] }
 0x11d   : > { %928 = vmatpush1.bf16.msra.mxu0 %v2685_v59  ;;  %v439_v59 = vpack.c.bf16 %v429_v58, %v429_v58 }
 0x11e   : > { %929 = vmatprep.subr.bf16.mxu0 %v2687_v60  ;;  %v2712_v60 = vld [vmem:[#allocation8 + $0x28] sm:$0xff]  }
 0x121   : > { %930 = vmatpush1.bf16.msra.mxu0 %v2690_v61  ;;  %v2713_v61 = vld [vmem:[#allocation8 + $0x30] sm:$0xff]  }
 0x122   : > { %931 = vmatprep.subr.bf16.mxu0 %v2692_v62  ;;  %v2714_v62 = vld [vmem:[#allocation8 + $0x38] sm:$0xff]  }
 0x125   : > { %932 = vmatpush1.bf16.msra.mxu0 %v2695_v63  ;;  %v2715_v63 = vld [vmem:[#allocation10] sm:$0xff]  }
 0x126   : > { %933 = vmatprep.subr.bf16.mxu0 %v2697_v0  ;;  %v2716_v0 = vld [vmem:[#allocation10 + $0x8] sm:$0xff]  }
 0x129   : > { %934 = vmatpush1.bf16.msra.mxu0 %v2700_v1  ;;  %v2717_v1 = vld [vmem:[#allocation10 + $0x10] sm:$0xff]  }
 0x12a   : > { %935 = vmatprep.subr.bf16.mxu0 %v2702_v2  ;;  %v2718_v2 = vld [vmem:[#allocation10 + $0x18] sm:$0xff]  }
 0x12d   : > { %936 = vmatpush1.bf16.msra.mxu0 %v2705_v3  ;;  %v2719_v3 = vld [vmem:[#allocation10 + $0x20] sm:$0xff]  }
 0x12e   : > { %2453 = vmatprep.subr.bf16.mxu0 %v2715_v63 }
 0x16d   : > { %v469_v6 = vpop.permute.xlu1 %468  ;;  %v463_v7 = vpop.permute.xlu0 %462 }
 0x16e   : > { %vm520_vm0 = vcmp.eq.s32.totalorder %v3405_v8, %v469_v6  ;;  %vm518_vm3 = vcmp.eq.s32.totalorder %v3405_v8, %v463_v7 }
 0x171   : > { %v472_v11 = vpop.permute.xlu1 %471  ;;  %v466_v12 = vpop.permute.xlu0 %465 }
 0x172   : > { %vm521_vm1 = vcmp.eq.s32.totalorder %v3405_v8, %v472_v11  ;;  %vm519_vm2 = vcmp.eq.s32.totalorder %v3405_v8, %v466_v12 }
 0x173   : > { %vm2127_vm4 = vmpackc.low %vm521_vm1, %vm520_vm0 }
 0x174   : > { %vm2125_vm5 = vmpackc.low %vm519_vm2, %vm518_vm3 }
 0x175   : > { %2126 = vmatprep.mubr.msk.bf16.mxu0 %vm2125_vm5, %v3029_v14  ;;  %2146 = vmatprep.mubr.msk.bf16.mxu1 %vm2125_vm5, %v3029_v14  ;;  %v478_v18 = vpop.permute.xlu1 %477  ;;  %v475_v19 = vpop.permute.xlu0 %474 }
 0x176   : > { %938 = vmatmul.mubr.bf16.vlgmr.msra.gmra.mrb[0].mxu0 %v430_v13  ;;  %1069 = vmatmul.mubr.bf16.vlgmr.msra.gmra.mrb[0].mxu1 %v430_v13  ;;  %vm523_vm6 = vcmp.eq.s32.totalorder %v3405_v8, %v478_v18  ;;  %vm522_vm7 = vcmp.eq.s32.totalorder %v3405_v8, %v475_v19 }
 0x177   : > { %2128 = vmatprep.mubr.msk.bf16.mxu0 %vm2127_vm4, %v3029_v14  ;;  %2148 = vmatprep.mubr.msk.bf16.mxu1 %vm2127_vm4, %v3029_v14  ;;  %vm2129_vm8 = vmpackc.low %vm523_vm6, %vm522_vm7 }
 0x178   : > { %2418 = vmatpush3.bf16.msra.mxu1 %v2707_v4  ;;  %2454 = vmatpush3.bf16.msra.mxu0 %v2715_v63  ;;  %v2720_v4 = vld [vmem:[#allocation10 + $0x28] sm:$0xff]  }
 0x179   : > { %2419 = vmatprep.subr.bf16.mxu1 %v2708_v15  ;;  %v484_v25 = vpop.permute.xlu1 %483  ;;  %v481_v26 = vpop.permute.xlu0 %480  ;;  %2455 = vmatprep.subr.bf16.mxu0 %v2716_v0 }
 0x17a   : > { %vm525_vm9 = vcmp.eq.s32.totalorder %v3405_v8, %v484_v25  ;;  %vm524_vm10 = vcmp.eq.s32.totalorder %v3405_v8, %v481_v26 }
 0x17b   : > { %vm2131_vm11 = vmpackc.low %vm525_vm9, %vm524_vm10 }
 0x17c   : > { %2420 = vmatpush3.bf16.msra.mxu1 %v2708_v15  ;;  %2456 = vmatpush3.bf16.msra.mxu0 %v2716_v0 }
 0x17d   : > { %2421 = vmatprep.subr.bf16.mxu1 %v2709_v20  ;;  %v490_v31 = vpop.permute.xlu1 %489  ;;  %v487_v32 = vpop.permute.xlu0 %486  ;;  %2457 = vmatprep.subr.bf16.mxu0 %v2717_v1 }
 0x17e   : > { %948 = vmatmul.mubr.bf16.gmra.mrb[4].mxu0 %v431_v21  ;;  %1077 = vmatmul.mubr.bf16.gmra.mrb[4].mxu1 %v431_v21  ;;  %vm527_vm12 = vcmp.eq.s32.totalorder %v3405_v8, %v490_v31  ;;  %vm526_vm13 = vcmp.eq.s32.totalorder %v3405_v8, %v487_v32 }
 0x17f   : > { %2130 = vmatprep.mubr.msk.bf16.mxu0 %vm2129_vm8, %v3029_v14  ;;  %2150 = vmatprep.mubr.msk.bf16.mxu1 %vm2129_vm8, %v3029_v14  ;;  %vm2133_vm14 = vmpackc.low %vm527_vm12, %vm526_vm13 }
 0x180   : > { %2422 = vmatpush3.bf16.msra.mxu1 %v2709_v20  ;;  %2458 = vmatpush3.bf16.msra.mxu0 %v2717_v1 }
 0x181   : > { %2423 = vmatprep.subr.bf16.mxu1 %v2710_v22  ;;  %v496_v36 = vpop.permute.xlu1 %495  ;;  %v493_v37 = vpop.permute.xlu0 %492  ;;  %2459 = vmatprep.subr.bf16.mxu0 %v2718_v2 }
 0x182   : > { %vm529_vm15 = vcmp.eq.s32.totalorder %v3405_v8, %v496_v36  ;;  %vm528_vm0 = vcmp.eq.s32.totalorder %v3405_v8, %v493_v37 }
 0x183   : > { %vm2135_vm1 = vmpackc.low %vm529_vm15, %vm528_vm0 }
 0x184   : > { %2424 = vmatpush3.bf16.msra.mxu1 %v2710_v22  ;;  %2460 = vmatpush3.bf16.msra.mxu0 %v2718_v2 }
 0x185   : > { %2425 = vmatprep.subr.bf16.mxu1 %v2711_v27  ;;  %v502_v41 = vpop.permute.xlu1 %501  ;;  %v499_v42 = vpop.permute.xlu0 %498  ;;  %2461 = vmatprep.subr.bf16.mxu0 %v2719_v3 }
 0x186   : > { %958 = vmatmul.mubr.bf16.gmra.mrb[8].mxu0 %v432_v28  ;;  %1085 = vmatmul.mubr.bf16.gmra.mrb[8].mxu1 %v432_v28  ;;  %vm531_vm2 = vcmp.eq.s32.totalorder %v3405_v8, %v502_v41  ;;  %vm530_vm3 = vcmp.eq.s32.totalorder %v3405_v8, %v499_v42 }
 0x187   : > { %2132 = vmatprep.mubr.msk.bf16.mxu0 %vm2131_vm11, %v3029_v14  ;;  %2152 = vmatprep.mubr.msk.bf16.mxu1 %vm2131_vm11, %v3029_v14  ;;  %vm2137_vm4 = vmpackc.low %vm531_vm2, %vm530_vm3 }
 0x188   : > { %2426 = vmatpush3.bf16.msra.mxu1 %v2711_v27  ;;  %2462 = vmatpush3.bf16.msra.mxu0 %v2719_v3 }
 0x189   : > { %v508_v46 = vpop.permute.xlu1 %507  ;;  %v505_v47 = vpop.permute.xlu0 %504  ;;  %2427 = vmatprep.subr.bf16.mxu1 %v2712_v60  ;;  %2463 = vmatprep.subr.bf16.mxu0 %v2720_v4 }
 0x18a   : > { %vm533_vm5 = vcmp.eq.s32.totalorder %v3405_v8, %v508_v46  ;;  %vm532_vm6 = vcmp.eq.s32.totalorder %v3405_v8, %v505_v47 }
 0x18b   : > { %vm2139_vm7 = vmpackc.low %vm533_vm5, %vm532_vm6 }
 0x18c   : > { %2428 = vmatpush3.bf16.msra.mxu1 %v2712_v60  ;;  %2464 = vmatpush3.bf16.msra.mxu0 %v2720_v4 }
 0x18d   : > { %v514_v51 = vpop.permute.xlu1 %513  ;;  %v511_v52 = vpop.permute.xlu0 %510  ;;  %2429 = vmatprep.subr.bf16.mxu1 %v2713_v61 }
 0x18e   : > { %968 = vmatmul.mubr.bf16.gmra.mrb[12].mxu0 %v433_v33  ;;  %1093 = vmatmul.mubr.bf16.gmra.mrb[12].mxu1 %v433_v33  ;;  %vm535_vm8 = vcmp.eq.s32.totalorder %v3405_v8, %v514_v51  ;;  %vm534_vm9 = vcmp.eq.s32.totalorder %v3405_v8, %v511_v52 }
 0x18f   : > { %2134 = vmatprep.mubr.msk.bf16.mxu0 %vm2133_vm14, %v3029_v14  ;;  %2154 = vmatprep.mubr.msk.bf16.mxu1 %vm2133_vm14, %v3029_v14  ;;  %vm2141_vm10 = vmpackc.low %vm535_vm8, %vm534_vm9 }
 0x190   : > { %2430 = vmatpush3.bf16.msra.mxu1 %v2713_v61 }
 0x191   : > { %v517_v56 = vpop.permute.xlu0 %516  ;;  %2431 = vmatprep.subr.bf16.mxu1 %v2714_v62 }
 0x192   : > { %vm536_vm11 = vcmp.eq.s32.totalorder %v3405_v8, %v517_v56 }
 0x193   : > { %vm2143_vm12 = vmpackc.low %vm536_vm11, %vm536_vm11 }
 0x194   : > { %2432 = vmatpush3.bf16.msra.mxu1 %v2714_v62 }
 0x196   : > { %978 = vmatmul.mubr.bf16.gmra.mrb[16].mxu0 %v434_v38  ;;  %1101 = vmatmul.mubr.bf16.gmra.mrb[16].mxu1 %v434_v38 }
 0x197   : > { %2136 = vmatprep.mubr.msk.bf16.mxu0 %vm2135_vm1, %v3029_v14  ;;  %2156 = vmatprep.mubr.msk.bf16.mxu1 %vm2135_vm1, %v3029_v14 }
 0x19e   : > { %988 = vmatmul.mubr.bf16.gmra.mrb[20].mxu0 %v435_v43  ;;  %1109 = vmatmul.mubr.bf16.gmra.mrb[20].mxu1 %v435_v43 }
 0x19f   : > { %2138 = vmatprep.mubr.msk.bf16.mxu0 %vm2137_vm4, %v3029_v14  ;;  %2158 = vmatprep.mubr.msk.bf16.mxu1 %vm2137_vm4, %v3029_v14 }
 0x1a6   : > { %998 = vmatmul.mubr.bf16.gmra.mrb[24].mxu0 %v436_v48  ;;  %1117 = vmatmul.mubr.bf16.gmra.mrb[24].mxu1 %v436_v48 }
 0x1a7   : > { %2140 = vmatprep.mubr.msk.bf16.mxu0 %vm2139_vm7, %v3029_v14  ;;  %2160 = vmatprep.mubr.msk.bf16.mxu1 %vm2139_vm7, %v3029_v14 }
 0x1ae   : > { %1008 = vmatmul.mubr.bf16.gmra.mrb[28].mxu0 %v437_v53  ;;  %1125 = vmatmul.mubr.bf16.gmra.mrb[28].mxu1 %v437_v53 }
 0x1af   : > { %2142 = vmatprep.mubr.msk.bf16.mxu0 %vm2141_vm10, %v3029_v14  ;;  %2162 = vmatprep.mubr.msk.bf16.mxu1 %vm2141_vm10, %v3029_v14 }
 0x1b6   : > { %1018 = vmatmul.mubr.bf16.gmra.mrb[32].mxu0 %v438_v57  ;;  %1133 = vmatmul.mubr.bf16.gmra.mrb[32].mxu1 %v438_v57 }
 0x1b7   : > { %2144 = vmatprep.mubr.msk.bf16.mxu0 %vm2143_vm12, %v3029_v14  ;;  %2164 = vmatprep.mubr.msk.bf16.mxu1 %vm2143_vm12, %v3029_v14 }
 0x1be   : > { %1028 = vmatmul.mubr.bf16.gmra.mrb[36].mxu0 %v439_v59  ;;  %1141 = vmatmul.mubr.bf16.gmra.mrb[36].mxu1 %v439_v59 }
 0x249   : > { %v939_v5 = vpop.f32.mrb[0].mxu0  ;;  %v2303_v6 = vpop.f32.mrb[0].mxu1 }
 0x24a   : > { %v3465_v7 = vpop.f32.mrb[1].mxu0  ;;  %v2304_v8 = vpop.f32.mrb[1].mxu1  ;;  %v1148_v12 = vmax.f32 %v939_v5, 0.0 }
 0x24b   : > { %v943_v9 = vpop.f32.mrb[2].mxu0  ;;  %v3467_v10 = vadd.f32 %v2304_v8, %v2303_v6  ;;  %v2306_v11 = vpop.f32.mrb[2].mxu1 }
 0x24c   : > { %v1149_v13 = vmax.f32 %v943_v9, 0.0  ;;  %v3469_v14 = vpop.f32.mrb[3].mxu0  ;;  %v2307_v15 = vpop.f32.mrb[3].mxu1 }
 0x24d   : > { %v3471_v16 = vadd.f32 %v2307_v15, %v2306_v11 }
 0x24e   : > { %v1167_v17 = vpack.c.bf16 %v1149_v13, %v1148_v12 }
 0x250   : > { %2433 = vmatprep.mubr.bf16.mxu1 %v1167_v17 }
 0x251   : > { %v949_v18 = vpop.f32.mrb[4].mxu0  ;;  %v2309_v19 = vpop.f32.mrb[4].mxu1 }
 0x252   : > { %v3473_v20 = vpop.f32.mrb[5].mxu0  ;;  %v2310_v21 = vpop.f32.mrb[5].mxu1  ;;  %v1150_v25 = vmax.f32 %v949_v18, 0.0 }
 0x253   : > { %v953_v22 = vpop.f32.mrb[6].mxu0  ;;  %v3475_v23 = vadd.f32 %v2310_v21, %v2309_v19  ;;  %v2312_v24 = vpop.f32.mrb[6].mxu1 }
 0x254   : > { %v1151_v26 = vmax.f32 %v953_v22, 0.0  ;;  %v3477_v27 = vpop.f32.mrb[7].mxu0  ;;  %v2313_v28 = vpop.f32.mrb[7].mxu1 }
 0x255   : > { %v3479_v29 = vadd.f32 %v2313_v28, %v2312_v24 }
 0x256   : > { %v1168_v30 = vpack.c.bf16 %v1151_v26, %v1150_v25 }
 0x258   : > { %2434 = vmatmul.mubr.bf16.vlgmr.msra.gmra.mrb[40].mxu1 %v1168_v30 }
 0x259   : > { %v959_v31 = vpop.f32.mrb[8].mxu0  ;;  %v2315_v32 = vpop.f32.mrb[8].mxu1 }
 0x25a   : > { %v3481_v33 = vpop.f32.mrb[9].mxu0  ;;  %v2316_v34 = vpop.f32.mrb[9].mxu1  ;;  %v1152_v38 = vmax.f32 %v959_v31, 0.0 }
 0x25b   : > { %v963_v35 = vpop.f32.mrb[10].mxu0  ;;  %v3483_v36 = vadd.f32 %v2316_v34, %v2315_v32  ;;  %v2318_v37 = vpop.f32.mrb[10].mxu1 }
 0x25c   : > { %v1153_v39 = vmax.f32 %v963_v35, 0.0  ;;  %v3485_v40 = vpop.f32.mrb[11].mxu0  ;;  %v2319_v41 = vpop.f32.mrb[11].mxu1 }
 0x25d   : > { %v3487_v42 = vadd.f32 %v2319_v41, %v2318_v37 }
 0x25e   : > { %v1169_v43 = vpack.c.bf16 %v1153_v39, %v1152_v38 }
 0x260   : > { %2437 = vmatprep.mubr.bf16.mxu1 %v1169_v43 }
 0x261   : > { %v969_v44 = vpop.f32.mrb[12].mxu0  ;;  %v2321_v45 = vpop.f32.mrb[12].mxu1 }
 0x262   : > { %v3489_v46 = vpop.f32.mrb[13].mxu0  ;;  %v2322_v47 = vpop.f32.mrb[13].mxu1  ;;  %v1154_v51 = vmax.f32 %v969_v44, 0.0 }
 0x263   : > { %v973_v48 = vpop.f32.mrb[14].mxu0  ;;  %v3491_v49 = vadd.f32 %v2322_v47, %v2321_v45  ;;  %v2324_v50 = vpop.f32.mrb[14].mxu1 }
 0x264   : > { %v1155_v52 = vmax.f32 %v973_v48, 0.0  ;;  %v3493_v53 = vpop.f32.mrb[15].mxu0  ;;  %v2325_v54 = vpop.f32.mrb[15].mxu1 }
 0x265   : > { %v3495_v55 = vadd.f32 %v2325_v54, %v2324_v50 }
 0x266   : > { %v1170_v56 = vpack.c.bf16 %v1155_v52, %v1154_v51 }
 0x268   : > { %2438 = vmatmul.mubr.bf16.gmra.mrb[44].mxu1 %v1170_v56 }
 0x269   : > { %v979_v57 = vpop.f32.mrb[16].mxu0  ;;  %v2327_v58 = vpop.f32.mrb[16].mxu1 }
 0x26a   : > { %v3497_v59 = vpop.f32.mrb[17].mxu0  ;;  %v2328_v60 = vpop.f32.mrb[17].mxu1  ;;  %v1156_v0 = vmax.f32 %v979_v57, 0.0 }
 0x26b   : > { %v983_v61 = vpop.f32.mrb[18].mxu0  ;;  %v3499_v62 = vadd.f32 %v2328_v60, %v2327_v58  ;;  %v2330_v63 = vpop.f32.mrb[18].mxu1 }
 0x26c   : > { %v1157_v1 = vmax.f32 %v983_v61, 0.0  ;;  %v3501_v2 = vpop.f32.mrb[19].mxu0  ;;  %v2331_v3 = vpop.f32.mrb[19].mxu1 }
 0x26d   : > { %v3503_v4 = vadd.f32 %v2331_v3, %v2330_v63 }
 0x26e   : > { %v1171_v5 = vpack.c.bf16 %v1157_v1, %v1156_v0 }
 0x270   : > { %2441 = vmatprep.mubr.bf16.mxu1 %v1171_v5 }
 0x271   : > { %v989_v6 = vpop.f32.mrb[20].mxu0  ;;  %v2333_v8 = vpop.f32.mrb[20].mxu1 }
 0x272   : > { %v3505_v9 = vpop.f32.mrb[21].mxu0  ;;  %v2334_v11 = vpop.f32.mrb[21].mxu1  ;;  %v1158_v17 = vmax.f32 %v989_v6, 0.0 }
 0x273   : > { %v993_v12 = vpop.f32.mrb[22].mxu0  ;;  %v3507_v13 = vadd.f32 %v2334_v11, %v2333_v8  ;;  %v2336_v15 = vpop.f32.mrb[22].mxu1 }
 0x274   : > { %v1159_v18 = vmax.f32 %v993_v12, 0.0  ;;  %v3509_v19 = vpop.f32.mrb[23].mxu0  ;;  %v2337_v21 = vpop.f32.mrb[23].mxu1 }
 0x275   : > { %v3511_v22 = vadd.f32 %v2337_v21, %v2336_v15 }
 0x276   : > { %v1172_v24 = vpack.c.bf16 %v1159_v18, %v1158_v17 }
 0x278   : > { %2442 = vmatmul.mubr.bf16.gmra.mrb[48].mxu1 %v1172_v24 }
 0x279   : > { %v999_v25 = vpop.f32.mrb[24].mxu0  ;;  %v2339_v26 = vpop.f32.mrb[24].mxu1 }
 0x27a   : > { %v3513_v28 = vpop.f32.mrb[25].mxu0  ;;  %v2340_v30 = vpop.f32.mrb[25].mxu1  ;;  %v1160_v35 = vmax.f32 %v999_v25, 0.0 }
 0x27b   : > { %v1003_v31 = vpop.f32.mrb[26].mxu0  ;;  %v3515_v32 = vadd.f32 %v2340_v30, %v2339_v26  ;;  %v2342_v34 = vpop.f32.mrb[26].mxu1 }
 0x27c   : > { %v1161_v37 = vmax.f32 %v1003_v31, 0.0  ;;  %v3517_v38 = vpop.f32.mrb[27].mxu0  ;;  %v2343_v39 = vpop.f32.mrb[27].mxu1 }
 0x27d   : > { %v3519_v41 = vadd.f32 %v2343_v39, %v2342_v34 }
 0x27e   : > { %v1173_v43 = vpack.c.bf16 %v1161_v37, %v1160_v35 }
 0x280   : > { %2445 = vmatprep.mubr.bf16.mxu1 %v1173_v43 }
 0x281   : > { %v1009_v44 = vpop.f32.mrb[28].mxu0  ;;  %v2345_v45 = vpop.f32.mrb[28].mxu1 }
 0x282   : > { %v3521_v47 = vpop.f32.mrb[29].mxu0  ;;  %v2346_v48 = vpop.f32.mrb[29].mxu1  ;;  %v1162_v54 = vmax.f32 %v1009_v44, 0.0 }
 0x283   : > { %v1013_v50 = vpop.f32.mrb[30].mxu0  ;;  %v3523_v51 = vadd.f32 %v2346_v48, %v2345_v45  ;;  %v2348_v52 = vpop.f32.mrb[30].mxu1  ;;  %v2721_v45 = vld [vmem:[#allocation10 + $0x30] sm:$0xff]   ;;  %v2722_v48 = vld [vmem:[#allocation10 + $0x38] sm:$0xff]  }
 0x284   : > { %v1163_v56 = vmax.f32 %v1013_v50, 0.0  ;;  %v3525_v57 = vpop.f32.mrb[31].mxu0  ;;  %v2349_v58 = vpop.f32.mrb[31].mxu1  ;;  %2465 = vmatprep.subr.bf16.mxu0 %v2721_v45  ;;  %v2723_v50 = vld [vmem:[#allocation11] sm:$0xff]  }
 0x285   : > { %v3527_v60 = vadd.f32 %v2349_v58, %v2348_v52  ;;  %2466 = vmatpush3.bf16.msra.mxu0 %v2721_v45  ;;  %v2724_v52 = vld [vmem:[#allocation11 + $0x8] sm:$0xff]   ;;  %2489 = vmatprep.subr.bf16.mxu1 %v2723_v50  ;;  %v2727_v58 = vld [vmem:[#allocation11 + $0x20] sm:$0xff]  }
 0x286   : > { %v1174_v61 = vpack.c.bf16 %v1163_v56, %v1162_v54  ;;  %2467 = vmatprep.subr.bf16.mxu0 %v2722_v48  ;;  %2490 = vmatpush3.bf16.msra.mxu1 %v2723_v50  ;;  %v2725_v54 = vld [vmem:[#allocation11 + $0x10] sm:$0xff]   ;;  %v2726_v56 = vld [vmem:[#allocation11 + $0x18] sm:$0xff]  }
 0x287   : > { %2491 = vmatprep.subr.bf16.mxu1 %v2724_v52 }
 0x288   : > { %2446 = vmatmul.mubr.bf16.gmra.mrb[52].mxu1 %v1174_v61  ;;  %v2728_v61 = vld [vmem:[#allocation11 + $0x28] sm:$0xff]  }
 0x289   : > { %v1019_v63 = vpop.f32.mrb[32].mxu0  ;;  %v2351_v0 = vpop.f32.mrb[32].mxu1  ;;  %2468 = vmatpush3.bf16.msra.mxu0 %v2722_v48 }
 0x28a   : > { %v3529_v1 = vpop.f32.mrb[33].mxu0  ;;  %v2352_v3 = vpop.f32.mrb[33].mxu1  ;;  %v1164_v11 = vmax.f32 %v1019_v63, 0.0  ;;  %2492 = vmatpush3.bf16.msra.mxu1 %v2724_v52 }
 0x28b   : > { %v1023_v5 = vpop.f32.mrb[34].mxu0  ;;  %v3531_v6 = vadd.f32 %v2352_v3, %v2351_v0  ;;  %v2354_v8 = vpop.f32.mrb[34].mxu1  ;;  %2493 = vmatprep.subr.bf16.mxu1 %v2725_v54 }
 0x28c   : > { %v1165_v12 = vmax.f32 %v1023_v5, 0.0  ;;  %v3533_v15 = vpop.f32.mrb[35].mxu0  ;;  %v2355_v17 = vpop.f32.mrb[35].mxu1 }
 0x28d   : > { %v3535_v18 = vadd.f32 %v2355_v17, %v2354_v8 }
 0x28e   : > { %v1175_v21 = vpack.c.bf16 %v1165_v12, %v1164_v11  ;;  %2494 = vmatpush3.bf16.msra.mxu1 %v2725_v54 }
 0x28f   : > { %2495 = vmatprep.subr.bf16.mxu1 %v2726_v56 }
 0x290   : > { %2449 = vmatprep.mubr.bf16.mxu1 %v1175_v21 }
 0x291   : > { %v1029_v24 = vpop.f32.mrb[36].mxu0  ;;  %v2357_v25 = vpop.f32.mrb[36].mxu1 }
 0x292   : > { %v1166_v26 = vmax.f32 %v1029_v24, 0.0  ;;  %v3537_v30 = vpop.f32.mrb[37].mxu0  ;;  %v2358_v31 = vpop.f32.mrb[37].mxu1  ;;  %2496 = vmatpush3.bf16.msra.mxu1 %v2726_v56 }
 0x293   : > { %v1033_v34 = vpop.f32.mrb[38].mxu0  ;;  %v3539_v35 = vadd.f32 %v2358_v31, %v2357_v25  ;;  %v2360_v37 = vpop.f32.mrb[38].mxu1  ;;  %2497 = vmatprep.subr.bf16.mxu1 %v2727_v58 }
 0x294   : > { %v1176_v39 = vpack.c.bf16 %v1166_v26, %v1166_v26  ;;  %v1034_v43 = vpop.f32.mrb[39].mxu0  ;;  %v2361_v44 = vpop.f32.mrb[39].mxu1 }
 0x296   : > { %2450 = vmatmul.mubr.bf16.gmra.mrb[56].mxu1 %v1176_v39 }
 0x297   : > { %2498 = vmatpush3.bf16.msra.mxu1 %v2727_v58 }
 0x298   : > { %2499 = vmatprep.subr.bf16.mxu1 %v2728_v61 }
 0x29b   : > { %2500 = vmatpush3.bf16.msra.mxu1 %v2728_v61 }
 0x32b   : > { %v2435_v63 = vpop.f32.mrb[40].mxu1 }
 0x32c   : > { %v1284_v0 = vadd.f32 %v2435_v63, %v3473_v20  ;;  %v1275_v3 = vpop.f32.mrb[41].mxu1 }
 0x32d   : > { %v1276_v5 = vadd.f32 %v1275_v3, %v3465_v7  ;;  %v2436_v8 = vpop.f32.mrb[42].mxu1 }
 0x32e   : > { %v1287_v11 = vadd.f32 %v2436_v8, %v3477_v27  ;;  %v1278_v12 = vpop.f32.mrb[43].mxu1  ;;  %v1355_v21 = vmax.f32 %v1284_v0, 0.0 }
 0x32f   : > { %v1279_v17 = vadd.f32 %v1278_v12, %v3469_v14  ;;  %v1353_v25 = vmax.f32 %v1276_v5, 0.0 }
 0x330   : > { %v1356_v24 = vmax.f32 %v1287_v11, 0.0 }
 0x331   : > { %v1354_v26 = vmax.f32 %v1279_v17, 0.0 }
 0x332   : > { %v1373_v31 = vpack.c.bf16 %v1356_v24, %v1355_v21 }
 0x333   : > { %v1372_v34 = vpack.c.bf16 %v1354_v26, %v1353_v25 }
 0x335   : > { %2469 = vmatprep.mubr.bf16.mxu0 %v1372_v34 }
 0x336   : > { %2470 = vmatmul.mubr.bf16.vlgmr.msra.gmra.mrb[40].mxu0 %v1373_v31 }
 0x33b   : > { %v2439_v37 = vpop.f32.mrb[44].mxu1 }
 0x33c   : > { %v1300_v20 = vadd.f32 %v2439_v37, %v3489_v46  ;;  %v1291_v39 = vpop.f32.mrb[45].mxu1 }
 0x33d   : > { %v1292_v7 = vadd.f32 %v1291_v39, %v3481_v33  ;;  %v2440_v43 = vpop.f32.mrb[46].mxu1 }
 0x33e   : > { %v1303_v27 = vadd.f32 %v2440_v43, %v3493_v53  ;;  %v1294_v44 = vpop.f32.mrb[47].mxu1  ;;  %v1359_v45 = vmax.f32 %v1300_v20, 0.0 }
 0x33f   : > { %v1295_v14 = vadd.f32 %v1294_v44, %v3485_v40  ;;  %v1357_v50 = vmax.f32 %v1292_v7, 0.0 }
 0x340   : > { %v1360_v48 = vmax.f32 %v1303_v27, 0.0 }
 0x341   : > { %v1358_v52 = vmax.f32 %v1295_v14, 0.0 }
 0x342   : > { %v1375_v54 = vpack.c.bf16 %v1360_v48, %v1359_v45 }
 0x343   : > { %v1374_v56 = vpack.c.bf16 %v1358_v52, %v1357_v50 }
 0x345   : > { %2473 = vmatprep.mubr.bf16.mxu0 %v1374_v56  ;;  %v2730_v56 = vld [vmem:[#allocation11 + $0x38] sm:$0xff]  }
 0x346   : > { %2474 = vmatmul.mubr.bf16.gmra.mrb[44].mxu0 %v1375_v54  ;;  %v2729_v54 = vld [vmem:[#allocation11 + $0x30] sm:$0xff]  }
 0x347   : > { %2501 = vmatprep.subr.bf16.mxu1 %v2729_v54 }
 0x348   : > { %2502 = vmatpush3.bf16.msra.mxu1 %v2729_v54 }
 0x349   : > { %2503 = vmatprep.subr.bf16.mxu1 %v2730_v56 }
 0x34b   : > { %v2443_v58 = vpop.f32.mrb[48].mxu1 }
 0x34c   : > { %v1316_v46 = vadd.f32 %v2443_v58, %v3505_v9  ;;  %v1307_v61 = vpop.f32.mrb[49].mxu1  ;;  %2504 = vmatpush3.bf16.msra.mxu1 %v2730_v56 }
 0x34d   : > { %v1308_v33 = vadd.f32 %v1307_v61, %v3497_v59  ;;  %v2444_v63 = vpop.f32.mrb[50].mxu1 }
 0x34e   : > { %v1319_v53 = vadd.f32 %v2444_v63, %v3509_v19  ;;  %v1310_v0 = vpop.f32.mrb[51].mxu1  ;;  %v1363_v3 = vmax.f32 %v1316_v46, 0.0 }
 0x34f   : > { %v1311_v40 = vadd.f32 %v1310_v0, %v3501_v2  ;;  %v1361_v8 = vmax.f32 %v1308_v33, 0.0 }
 0x350   : > { %v1364_v5 = vmax.f32 %v1319_v53, 0.0 }
 0x351   : > { %v1362_v11 = vmax.f32 %v1311_v40, 0.0 }
 0x352   : > { %v1377_v12 = vpack.c.bf16 %v1364_v5, %v1363_v3 }
 0x353   : > { %v1376_v17 = vpack.c.bf16 %v1362_v11, %v1361_v8 }
 0x355   : > { %2477 = vmatprep.mubr.bf16.mxu0 %v1376_v17 }
 0x356   : > { %2478 = vmatmul.mubr.bf16.gmra.mrb[48].mxu0 %v1377_v12 }
 0x35b   : > { %v2447_v21 = vpop.f32.mrb[52].mxu1 }
 0x35c   : > { %v1332_v9 = vadd.f32 %v2447_v21, %v3521_v47  ;;  %v1323_v24 = vpop.f32.mrb[53].mxu1 }
 0x35d   : > { %v1324_v59 = vadd.f32 %v1323_v24, %v3513_v28  ;;  %v2448_v25 = vpop.f32.mrb[54].mxu1 }
 0x35e   : > { %v1335_v19 = vadd.f32 %v2448_v25, %v3525_v57  ;;  %v1326_v26 = vpop.f32.mrb[55].mxu1  ;;  %v1367_v31 = vmax.f32 %v1332_v9, 0.0 }
 0x35f   : > { %v1327_v2 = vadd.f32 %v1326_v26, %v3517_v38  ;;  %v1365_v37 = vmax.f32 %v1324_v59, 0.0 }
 0x360   : > { %v1368_v34 = vmax.f32 %v1335_v19, 0.0 }
 0x361   : > { %v1366_v20 = vmax.f32 %v1327_v2, 0.0 }
 0x362   : > { %v1379_v39 = vpack.c.bf16 %v1368_v34, %v1367_v31 }
 0x363   : > { %v1378_v7 = vpack.c.bf16 %v1366_v20, %v1365_v37 }
 0x365   : > { %2481 = vmatprep.mubr.bf16.mxu0 %v1378_v7 }
 0x366   : > { %2482 = vmatmul.mubr.bf16.gmra.mrb[52].mxu0 %v1379_v39 }
 0x369   : > { %v2451_v43 = vpop.f32.mrb[56].mxu1 }
 0x36a   : > { %v1348_v47 = vadd.f32 %v2451_v43, %v3537_v30  ;;  %v1339_v27 = vpop.f32.mrb[57].mxu1 }
 0x36b   : > { %v1340_v28 = vadd.f32 %v1339_v27, %v3529_v1  ;;  %v2452_v44 = vpop.f32.mrb[58].mxu1 }
 0x36c   : > { %v1342_v14 = vpop.f32.mrb[59].mxu1  ;;  %v1371_v45 = vmax.f32 %v1348_v47, 0.0 }
 0x36d   : > { %v1343_v57 = vadd.f32 %v1342_v14, %v3533_v15  ;;  %v1369_v38 = vmax.f32 %v1340_v28, 0.0 }
 0x36e   : > { %v1381_v52 = vpack.c.bf16 %v1371_v45, %v1371_v45 }
 0x36f   : > { %v1370_v48 = vmax.f32 %v1343_v57, 0.0 }
 0x371   : > { %v1380_v50 = vpack.c.bf16 %v1370_v48, %v1369_v38 }
 0x373   : > { %2485 = vmatprep.mubr.bf16.mxu0 %v1380_v50 }
 0x374   : > { %2486 = vmatmul.mubr.bf16.gmra.mrb[56].mxu0 %v1381_v52 }
 0x409   : > { %v2471_v30 = vpop.f32.mrb[40].mxu0 }
 0x40a   : > { %v1489_v1 = vadd.f32 %v2471_v30, %v3475_v23  ;;  %v1480_v58 = vpop.f32.mrb[41].mxu0 }
 0x40b   : > { %v1481_v46 = vadd.f32 %v3467_v10, %v1480_v58  ;;  %v2472_v15 = vpop.f32.mrb[42].mxu0 }
 0x40c   : > { %v1492_v61 = vadd.f32 %v2472_v15, %v3479_v29  ;;  %v1483_v33 = vpop.f32.mrb[43].mxu0  ;;  %v1560_v53 = vmax.f32 %v1489_v1, 0.0 }
 0x40d   : > { %v1484_v63 = vadd.f32 %v3471_v16, %v1483_v33  ;;  %v1558_v40 = vmax.f32 %v1481_v46, 0.0 }
 0x40e   : > { %v1561_v0 = vmax.f32 %v1492_v61, 0.0 }
 0x40f   : > { %v1559_v3 = vmax.f32 %v1484_v63, 0.0  ;;  %v3579_v63 = vld [vmem:[#allocation13] ss:$0 sm:$0xff] }
 0x410   : > { %v1578_v5 = vpack.c.bf16 %v1561_v0, %v1560_v53 }
 0x411   : > { %v1577_v8 = vpack.c.bf16 %v1559_v3, %v1558_v40 }
 0x413   : > { %2505 = vmatprep.mubr.bf16.mxu1 %v1577_v8 }
 0x414   : > { %2506 = vmatmul.mubr.bf16.vlgmr.msra.gmra.mrb[60].mxu1 %v1578_v5 }
 0x419   : > { %v2475_v11 = vpop.f32.mrb[44].mxu0 }
 0x41a   : > { %v1505_v23 = vadd.f32 %v2475_v11, %v3491_v49  ;;  %v1496_v12 = vpop.f32.mrb[45].mxu0 }
 0x41b   : > { %v1497_v10 = vadd.f32 %v3483_v36, %v1496_v12  ;;  %v2476_v17 = vpop.f32.mrb[46].mxu0 }
 0x41c   : > { %v1508_v29 = vadd.f32 %v2476_v17, %v3495_v55  ;;  %v1499_v21 = vpop.f32.mrb[47].mxu0  ;;  %v1564_v9 = vmax.f32 %v1505_v23, 0.0 }
 0x41d   : > { %v1500_v16 = vadd.f32 %v3487_v42, %v1499_v21  ;;  %v1562_v59 = vmax.f32 %v1497_v10, 0.0 }
 0x41e   : > { %v1565_v24 = vmax.f32 %v1508_v29, 0.0 }
 0x41f   : > { %v1563_v25 = vmax.f32 %v1500_v16, 0.0 }
 0x420   : > { %v1580_v19 = vpack.c.bf16 %v1565_v24, %v1564_v9 }
 0x421   : > { %v1579_v26 = vpack.c.bf16 %v1563_v25, %v1562_v59 }
 0x423   : > { %2509 = vmatprep.mubr.bf16.mxu1 %v1579_v26 }
 0x424   : > { %2510 = vmatmul.mubr.bf16.gmra.mrb[64].mxu1 %v1580_v19 }
 0x429   : > { %v2479_v2 = vpop.f32.mrb[48].mxu0 }
 0x42a   : > { %v1521_v49 = vadd.f32 %v2479_v2, %v3507_v13  ;;  %v1512_v31 = vpop.f32.mrb[49].mxu0 }
 0x42b   : > { %v1513_v36 = vadd.f32 %v3499_v62, %v1512_v31  ;;  %v2480_v34 = vpop.f32.mrb[50].mxu0 }
 0x42c   : > { %v1524_v55 = vadd.f32 %v2480_v34, %v3511_v22  ;;  %v1515_v37 = vpop.f32.mrb[51].mxu0  ;;  %v1568_v20 = vmax.f32 %v1521_v49, 0.0 }
 0x42d   : > { %v1516_v42 = vadd.f32 %v3503_v4, %v1515_v37  ;;  %v1566_v7 = vmax.f32 %v1513_v36, 0.0 }
 0x42e   : > { %v1569_v39 = vmax.f32 %v1524_v55, 0.0 }
 0x42f   : > { %v1567_v43 = vmax.f32 %v1516_v42, 0.0 }
 0x430   : > { %v1582_v47 = vpack.c.bf16 %v1569_v39, %v1568_v20 }
 0x431   : > { %v1581_v27 = vpack.c.bf16 %v1567_v43, %v1566_v7 }
 0x433   : > { %2513 = vmatprep.mubr.bf16.mxu1 %v1581_v27 }
 0x434   : > { %2514 = vmatmul.mubr.bf16.gmra.mrb[68].mxu1 %v1582_v47 }
 0x439   : > { %v2483_v28 = vpop.f32.mrb[52].mxu0 }
 0x43a   : > { %v1537_v13 = vadd.f32 %v2483_v28, %v3523_v51  ;;  %v1528_v44 = vpop.f32.mrb[53].mxu0 }
 0x43b   : > { %v1529_v62 = vadd.f32 %v3515_v32, %v1528_v44  ;;  %v2484_v14 = vpop.f32.mrb[54].mxu0 }
 0x43c   : > { %v1540_v22 = vadd.f32 %v2484_v14, %v3527_v60  ;;  %v1531_v57 = vpop.f32.mrb[55].mxu0  ;;  %v1572_v45 = vmax.f32 %v1537_v13, 0.0 }
 0x43d   : > { %v1532_v4 = vadd.f32 %v3519_v41, %v1531_v57  ;;  %v1570_v48 = vmax.f32 %v1529_v62, 0.0 }
 0x43e   : > { %v1573_v38 = vmax.f32 %v1540_v22, 0.0 }
 0x43f   : > { %v1571_v50 = vmax.f32 %v1532_v4, 0.0 }
 0x440   : > { %v1584_v52 = vpack.c.bf16 %v1573_v38, %v1572_v45 }
 0x441   : > { %v1583_v54 = vpack.c.bf16 %v1571_v50, %v1570_v48 }
 0x443   : > { %2517 = vmatprep.mubr.bf16.mxu1 %v1583_v54 }
 0x444   : > { %2518 = vmatmul.mubr.bf16.gmra.mrb[72].mxu1 %v1584_v52 }
 0x447   : > { %v2487_v56 = vpop.f32.mrb[56].mxu0 }
 0x448   : > { %v1553_v51 = vadd.f32 %v2487_v56, %v3539_v35  ;;  %v1544_v30 = vpop.f32.mrb[57].mxu0 }
 0x449   : > { %v1545_v32 = vadd.f32 %v3531_v6, %v1544_v30  ;;  %v2488_v1 = vpop.f32.mrb[58].mxu0 }
 0x44a   : > { %v1547_v60 = vpop.f32.mrb[59].mxu0  ;;  %v1576_v41 = vmax.f32 %v1553_v51, 0.0 }
 0x44b   : > { %v1548_v58 = vadd.f32 %v3535_v18, %v1547_v60  ;;  %v1574_v46 = vmax.f32 %v1545_v32, 0.0 }
 0x44c   : > { %v1586_v33 = vpack.c.bf16 %v1576_v41, %v1576_v41 }
 0x44d   : > { %v1575_v15 = vmax.f32 %v1548_v58, 0.0 }
 0x44f   : > { %v1585_v61 = vpack.c.bf16 %v1575_v15, %v1574_v46 }
 0x451   : > { %2521 = vmatprep.mubr.bf16.mxu1 %v1585_v61 }
 0x452   : > { %2522 = vmatmul.mubr.bf16.gmra.mrb[76].mxu1 %v1586_v33 }
 0x4e7   : > { %v2507_v53 = vpop.f32.mrb[60].mxu1 }
 0x4e8   : > { %v1701_v35 = vadd.f32 %v2507_v53, %v3579_v63  ;;  %v1692_v0 = vpop.f32.mrb[61].mxu1 }
 0x4e9   : > { %v1693_v6 = vadd.f32 %v3579_v63, %v1692_v0  ;;  %v2508_v40 = vpop.f32.mrb[62].mxu1 }
 0x4ea   : > { %v1704_v3 = vadd.f32 %v2508_v40, %v3579_v63  ;;  %v1695_v18 = vpop.f32.mrb[63].mxu1  ;;  %v1772_v8 = vmax.f32 %v1701_v35, 0.0 }
 0x4eb   : > { %v1696_v5 = vadd.f32 %v3579_v63, %v1695_v18  ;;  %v1770_v23 = vmax.f32 %v1693_v6, 0.0 }
 0x4ec   : > { %v1773_v11 = vmax.f32 %v1704_v3, 0.0 }
 0x4ed   : > { %v1771_v12 = vmax.f32 %v1696_v5, 0.0 }
 0x4ee   : > { %v2242_v10 = vpack.c.bf16 %v1773_v11, %v1772_v8 }
 0x4ef   : > { %v2237_v17 = vpack.c.bf16 %v1771_v12, %v1770_v23 }
 0x4f0   : > { %2279 = vst [vmem:[%s3586_s18 + $0x8] sm:$0xff] %v2242_v10  }
 0x4f1   : > { %2238 = vst [vmem:[%s3586_s18] sm:$0xff] %v2237_v17  }
 0x4f7   : > { %v2511_v29 = vpop.f32.mrb[64].mxu1 }
 0x4f8   : > { %v1717_v21 = vadd.f32 %v2511_v29, %v3579_v63  ;;  %v1708_v16 = vpop.f32.mrb[65].mxu1 }
 0x4f9   : > { %v1709_v9 = vadd.f32 %v3579_v63, %v1708_v16  ;;  %v2512_v24 = vpop.f32.mrb[66].mxu1 }
 0x4fa   : > { %v1720_v59 = vadd.f32 %v2512_v24, %v3579_v63  ;;  %v1711_v25 = vpop.f32.mrb[67].mxu1  ;;  %v1776_v26 = vmax.f32 %v1717_v21, 0.0 }
 0x4fb   : > { %v1712_v19 = vadd.f32 %v3579_v63, %v1711_v25  ;;  %v1774_v49 = vmax.f32 %v1709_v9, 0.0 }
 0x4fc   : > { %v1777_v2 = vmax.f32 %v1720_v59, 0.0 }
 0x4fd   : > { %v1775_v31 = vmax.f32 %v1712_v19, 0.0 }
 0x4fe   : > { %v2252_v36 = vpack.c.bf16 %v1777_v2, %v1776_v26 }
 0x4ff   : > { %v2247_v34 = vpack.c.bf16 %v1775_v31, %v1774_v49 }
 0x500   : > { %2281 = vst [vmem:[%s3586_s18 + $0x18] sm:$0xff] %v2252_v36  }
 0x501   : > { %2280 = vst [vmem:[%s3586_s18 + $0x10] sm:$0xff] %v2247_v34  }
 0x507   : > { %v2515_v55 = vpop.f32.mrb[68].mxu1 }
 0x508   : > { %v1733_v37 = vadd.f32 %v2515_v55, %v3579_v63  ;;  %v1724_v42 = vpop.f32.mrb[69].mxu1 }
 0x509   : > { %v1725_v20 = vadd.f32 %v3579_v63, %v1724_v42  ;;  %v2516_v39 = vpop.f32.mrb[70].mxu1 }
 0x50a   : > { %v1736_v7 = vadd.f32 %v2516_v39, %v3579_v63  ;;  %v1727_v43 = vpop.f32.mrb[71].mxu1  ;;  %v1780_v27 = vmax.f32 %v1733_v37, 0.0 }
 0x50b   : > { %v1728_v47 = vadd.f32 %v3579_v63, %v1727_v43  ;;  %v1778_v13 = vmax.f32 %v1725_v20, 0.0 }
 0x50c   : > { %v1781_v28 = vmax.f32 %v1736_v7, 0.0 }
 0x50d   : > { %v1779_v44 = vmax.f32 %v1728_v47, 0.0 }
 0x50e   : > { %v2262_v62 = vpack.c.bf16 %v1781_v28, %v1780_v27 }
 0x50f   : > { %v2257_v14 = vpack.c.bf16 %v1779_v44, %v1778_v13 }
 0x510   : > { %2283 = vst [vmem:[%s3586_s18 + $0x28] sm:$0xff] %v2262_v62  }
 0x511   : > { %2282 = vst [vmem:[%s3586_s18 + $0x20] sm:$0xff] %v2257_v14  }
 0x517   : > { %v2519_v22 = vpop.f32.mrb[72].mxu1 }
 0x518   : > { %v1749_v57 = vadd.f32 %v2519_v22, %v3579_v63  ;;  %v1740_v4 = vpop.f32.mrb[73].mxu1 }
 0x519   : > { %v1741_v45 = vadd.f32 %v3579_v63, %v1740_v4  ;;  %v2520_v38 = vpop.f32.mrb[74].mxu1 }
 0x51a   : > { %v1752_v48 = vadd.f32 %v2520_v38, %v3579_v63  ;;  %v1743_v50 = vpop.f32.mrb[75].mxu1  ;;  %v1784_v54 = vmax.f32 %v1749_v57, 0.0 }
 0x51b   : > { %v1744_v52 = vadd.f32 %v3579_v63, %v1743_v50  ;;  %v1782_v51 = vmax.f32 %v1741_v45, 0.0 }
 0x51c   : > { %v1785_v56 = vmax.f32 %v1752_v48, 0.0 }
 0x51d   : > { %v1783_v30 = vmax.f32 %v1744_v52, 0.0 }
 0x51e   : > { %v2272_v32 = vpack.c.bf16 %v1785_v56, %v1784_v54 }
 0x51f   : > { %v2267_v1 = vpack.c.bf16 %v1783_v30, %v1782_v51 }
 0x520   : > { %2285 = vst [vmem:[%s3586_s18 + $0x38] sm:$0xff] %v2272_v32  }
 0x521   : > { %2284 = vst [vmem:[%s3586_s18 + $0x30] sm:$0xff] %v2267_v1  }
 0x525   : > { %v2523_v60 = vpop.f32.mrb[76].mxu1 }
 0x526   : > { %v1765_v58 = vadd.f32 %v2523_v60, %v3579_v63  ;;  %v1756_v41 = vpop.f32.mrb[77].mxu1 }
 0x527   : > { %v1757_v46 = vadd.f32 %v3579_v63, %v1756_v41  ;;  %v2524_v15 = vpop.f32.mrb[78].mxu1 }
 0x528   : > { %v1788_v61 = vmax.f32 %v1765_v58, 0.0  ;;  %v1759_v33 = vpop.f32.mrb[79].mxu1 }
 0x529   : > { %v1760_v53 = vadd.f32 %v3579_v63, %v1759_v33  ;;  %v1786_v0 = vmax.f32 %v1757_v46, 0.0 }
 0x52a   : > { %v2232_v35 = vpack.c.bf16 %v1788_v61, %v1788_v61 }
 0x52b   : > { %v1787_v6 = vmax.f32 %v1760_v53, 0.0 }
 0x52c   : > { %1884 = vst [vmem:[%s3586_s18 + $0x48] sm:$0xf] %v2232_v35 }
 0x52d   : > { %v2277_v40 = vpack.c.bf16 %v1787_v6, %v1786_v0 }
 0x52f   : > { %2286 = vst [vmem:[%s3586_s18 + $0x40] sm:$0xff] %v2277_v40  }
 0x530   : > { %2944 = shalt.err (!%p2941_p8)
}
 0x531   : > { %s2945_s22 = scalar_lea.hbm %s3617_s15, 1216  ;;  %s2949_s0 = scalar_lea.hbm %s3671_s7, 2432 }
 0x532   : > { %p2946_p4 = scmp.ne.s32.totalorder %s3617_s15, %s2945_s22  ;;  %p2950_p1 = scmp.lt.u32.totalorder %s3617_s15, %s3671_s7 }
 0x533   : > { %p2951_p11 = scmp.lt.u32.totalorder %s2949_s0, %s2945_s22  ;;  %p2953_p2 = scmp.lt.u32.totalorder %s2945_s22, %s3617_s15 }
 0x534   : > { %p2947_p3 = pnand %p2946_p4, %p3700_p13 }
 0x535   : > { %p2952_p12 = por %p2951_p11, %p2950_p1 }
 0x536   : > { %p2948_p10 = pneg %p2947_p3 }
 0x537   : > { %p2954_p6 = por %p2953_p2, %p2952_p12 }
 0x539   : > { %p2955_p9 = pnand %p2954_p6, %p2948_p10 }
 0x53b   : > { %2958 = shalt.err (!%p2955_p9)
}
 0x53c   : > { %s3031_s14 = smov 64   ;;  %s3032_s18 = smov 4  }
 0x53d   : > { %2553 = dma.vmem_to_hbm [thread:$0]  (%p3700_p13), %s3619_s13, 1216, %s3617_s15, %s1886_s30, %s3031_s14, %s3031_s14, %s3032_s18  }
 0x53e PF: > { %s1914_s20 = sand.u32 1, %s3001_s24   ;;  %p3701_p0 = scmp.ne.s32.totalorder %s3689_s16, 0 }
 0x53f   : > { %p3702_p5 = scmp.ge.s32.totalorder %s3013_s27, 2  ;;  %s1915_s29 = scalar_lea.sflag [#allocation4], %s1914_s20 }
 0x541   : > { %p2579_p7 = pnand %p3702_p5, %p3701_p0 }
 0x543   : > { %2996 = dma.done.wait (!%p2579_p7), %s1915_s29, 1216  }
 0x544   : > { %2998 = vsyncadd (!%p2579_p7), %s1915_s29, 4294966080  ;;  %p25_p8 = scmp.ge.s32.totalorder %s3236_s11, 4   ;;  %s3703_s24 = smov %s3005_s25 }
 0x545   : > { %s3704_s25 = smov %s3009_s26  ;;  %s3705_s26 = smov %s3248_s28 }
 0x546   : > { %s3706_s27 = smov %s3236_s11  ;;  %27 = sbr.rel (!%p25_p8) target bundleno = 14 (0xe), region = 126 }
 0x54d   :  { %1920 = vsyncpa [#allocation3], 1 }
 0x54e   :  { %1922 = vsyncpa [#allocation3 + $0x1], 1 }
 0x54f   :  { %1923 = vsyncpa [#allocation6], 1 }
 0x550   :  { %1925 = vsyncpa [#allocation6 + $0x1], 1 }
 0x551   :  { %1926 = vsyncpa [#allocation9], 1 }
 0x552   :  { %1927 = vsyncpa [#allocation12], 1 }
 0x553   :  { %1928 = vsyncpa [#allocation4], 1 }
 0x554   :  { %1930 = vsyncpa [#allocation4 + $0x1], 1 }

</bundles_post_ra>
